<compile_context>
chip_gen: v7x
topology: tpu7x:2x2x1
jax: 0.10.0
libtpu: 0.0.40
codegen_flags: <defaults>
</compile_context>

<pallas_src>
import math

import numpy as np

import jax
import jax.numpy as jnp
from jax.experimental import pallas as pl
from jax.experimental.pallas import tpu as pltpu


# ------------------------------- helpers ----------------------------------- #

def _round_up(v, m):
    return ((v + m - 1) // m) * m


# --------------------------- fused Pallas kernel ---------------------------- #

def _build_fused_kernel(layer_kinds, compute_dtype):
    """Builds a kernel closed over the static layer structure.

    Ref order: x_ref, z_ref, *weight/bias refs (per layer_kinds), o_ref.
      "dense" layer consumes (w_ref, b_ref)
      "skip"  layer consumes (wy_ref, wz_ref, b_ref)
    """

    def kernel(*refs):
        x_ref, z_ref = refs[0], refs[1]
        o_ref = refs[-1]
        wb = refs[2:-1]

        # Cast activations once; all matmuls are bf16 x bf16 -> f32 on the MXU.
        y = x_ref[...].astype(compute_dtype)        # (TM, input_dim)
        z_c = z_ref[...].astype(compute_dtype)      # (TM, skip_dim), reused by skips

        idx = 0
        for kind in layer_kinds:
            if kind == "dense":
                w_ref, b_ref = wb[idx], wb[idx + 1]
                idx += 2
                acc = jnp.dot(y, w_ref[...], preferred_element_type=jnp.float32)
            else:  # "skip": relu(cat(y, z) @ W + b) == relu(y @ Wy + z @ Wz + b)
                wy_ref, wz_ref, b_ref = wb[idx], wb[idx + 1], wb[idx + 2]
                idx += 3
                acc = jnp.dot(y, wy_ref[...], preferred_element_type=jnp.float32)
                acc = acc + jnp.dot(z_c, wz_ref[...],
                                    preferred_element_type=jnp.float32)
            # Bias add + ReLU in f32 (v5e has no bf16 VALU); keep y in bf16
            # between layers to halve vreg/VMEM pressure at large TM.
            y = jnp.maximum(acc + b_ref[...], 0.0).astype(compute_dtype)

        o_ref[...] = y.astype(o_ref.dtype)

    return kernel


# --------------------------- parameter handling ----------------------------- #

def init_mlp_with_input_skips(key, n_layers, input_dim, output_dim, skip_dim,
                              hidden_dim, input_skips):
    """Deterministic init mirroring torch.nn.Linear defaults.

    Returns a list of (W, b) with W stored (dim_in, dim_out).
    NOTE: output_dim is unused, exactly as in the PyTorch module.
    """
    del output_dim  # unused by the reference module as well
    params = []
    skips = set(input_skips)
    for li in range(n_layers):
        if li == 0:
            dimin, dimout = input_dim, hidden_dim
        elif li in skips:
            dimin, dimout = hidden_dim + skip_dim, hidden_dim
        else:
            dimin, dimout = hidden_dim, hidden_dim
        key, kw, kb = jax.random.split(key, 3)
        bound = 1.0 / math.sqrt(dimin)
        w = jax.random.uniform(kw, (dimin, dimout), jnp.float32, -bound, bound)
        b = jax.random.uniform(kb, (dimout,), jnp.float32, -bound, bound)
        params.append((w, b))
    return params


def prepare_params(params, input_skips, input_dim, hidden_dim, skip_dim,
                   compute_dtype=jnp.bfloat16):
    """Pre-split skip weights, pad ONLY the hidden (N) lanes to 128, cast bf16.

    Done ONCE (hoisted out of the forward).  K dims facing x / z stay at their
    real widths (x/z are fed un-padded).  Padded rows/cols/bias entries are
    zero so padded lanes stay exactly zero through ReLU.
    """
    dh_p = _round_up(max(hidden_dim, 1), 128)
    skips = set(input_skips)

    layer_kinds = []
    flat_wb = []
    kn_sum = 0  # sum of K*N actually fed to the MXU (for the cost estimate)

    for li, (w, b) in enumerate(params):
        b_p = jnp.zeros((1, dh_p), jnp.float32).at[0, :hidden_dim].set(b)
        if li in skips and li != 0:
            wy = w[:hidden_dim, :]
            wz = w[hidden_dim:, :]
            wy_p = (jnp.zeros((dh_p, dh_p), jnp.float32)
                    .at[:hidden_dim, :hidden_dim].set(wy)).astype(compute_dtype)
            # Wz keeps its REAL K (= skip_dim): z is fed at real width.
            wz_p = (jnp.zeros((skip_dim, dh_p), jnp.float32)
                    .at[:, :hidden_dim].set(wz)).astype(compute_dtype)
            layer_kinds.append("skip")
            flat_wb += [wy_p, wz_p, b_p]
            kn_sum += (dh_p + skip_dim) * dh_p
        elif li == 0:
            # Layer 0 keeps its REAL K (= input_dim): x is fed at real width.
            w_p = (jnp.zeros((input_dim, dh_p), jnp.float32)
                   .at[:, :hidden_dim].set(w)).astype(compute_dtype)
            layer_kinds.append("dense")
            flat_wb += [w_p, b_p]
            kn_sum += input_dim * dh_p
        else:
            w_p = (jnp.zeros((dh_p, dh_p), jnp.float32)
                   .at[:hidden_dim, :hidden_dim].set(w)).astype(compute_dtype)
            layer_kinds.append("dense")
            flat_wb += [w_p, b_p]
            kn_sum += dh_p * dh_p

    return {
        "layer_kinds": tuple(layer_kinds),
        "flat_wb": flat_wb,
        "dh_p": dh_p,
        "hidden_dim": hidden_dim,
        "compute_dtype": compute_dtype,
        "kn_sum": kn_sum,
    }


# -------------------------------- forward ----------------------------------- #

def mlp_with_input_skips_forward(prepped, x, z):
    """Forward pass. x: (..., input_dim), z: (..., skip_dim) -> (..., hidden_dim)."""
    hidden_dim = prepped["hidden_dim"]
    dh_p = prepped["dh_p"]
    flat_wb = prepped["flat_wb"]
    compute_dtype = prepped["compute_dtype"]

    lead = x.shape[:-1]
    m = math.prod(lead) if lead else 1
    x2 = x.reshape(m, x.shape[-1])   # real feature width, native dtype, no pad copy
    z2 = z.reshape(m, z.shape[-1])

    # Row tile: multiple of 16 sublanes (bf16 output tile), capped at 1024.
    # Aim for >= 2 grid steps so v7x's two TensorCores both get work; on
    # v5e/v6e (single TC) an extra step costs ~0.35us -> negligible.
    TM_CAP = 1024
    tm = max(16, min(TM_CAP, _round_up(pl.cdiv(m, 2), 16)))

    kernel = _build_fused_kernel(prepped["layer_kinds"], compute_dtype)
    out_itemsize = np.dtype(compute_dtype).itemsize

    def run(xp, zp, n_rows, single_buffer_weights):
        in_specs = [
            pl.BlockSpec((tm, xp.shape[1]), lambda i: (i, 0)),   # x row tile
            pl.BlockSpec((tm, zp.shape[1]), lambda i: (i, 0)),   # z row tile
        ]
        # Weights/biases: full blocks with constant index maps -> DMA'd once,
        # resident across the grid.  Single-buffering halves their VMEM
        # footprint (double-buffering a constant block is pure waste).
        for arr in flat_wb:
            if single_buffer_weights:
                spec = pl.BlockSpec(arr.shape, lambda i: (0, 0),
                                    pipeline_mode=pl.Buffered(1))
            else:
                spec = pl.BlockSpec(arr.shape, lambda i: (0, 0))
            in_specs.append(spec)
        out_specs = pl.BlockSpec((tm, dh_p), lambda i: (i, 0))

        flops = 2 * n_rows * prepped["kn_sum"]
        bytes_accessed = (
            xp.size * xp.dtype.itemsize + zp.size * zp.dtype.itemsize
            + n_rows * dh_p * out_itemsize
            + sum(a.size * a.dtype.itemsize for a in flat_wb))

        return pl.pallas_call(
            kernel,
            out_shape=jax.ShapeDtypeStruct((n_rows, dh_p), compute_dtype),
            grid=(pl.cdiv(n_rows, tm),),
            in_specs=in_specs,
            out_specs=out_specs,
            compiler_params=pltpu.CompilerParams(
                dimension_semantics=("parallel",),
                vmem_limit_bytes=64 * 1024 * 1024),
            cost_estimate=pl.CostEstimate(flops=flops, transcendentals=0,
                                          bytes_accessed=bytes_accessed),
        )(xp, zp, *flat_wb)

    try:
        # Primary path: no host-side padding at all.  A ragged last row tile is
        # handled by Pallas: OOB input rows are garbage but rows are
        # independent (matmul + elementwise), and OOB output rows are masked.
        out = jax.block_until_ready(run(x2, z2, m, True))
    except Exception:
        # Insurance fallback: row-pad to a tile multiple (tiny copy) and use
        # default double-buffered weight blocks.
        m_pad = _round_up(m, tm)
        xp = jnp.zeros((m_pad, x2.shape[1]), x2.dtype).at[:m].set(x2)
        zp = jnp.zeros((m_pad, z2.shape[1]), z2.dtype).at[:m].set(z2)
        out = jax.block_until_ready(run(xp, zp, m_pad, False))

    return out[:m, :hidden_dim].astype(x.dtype).reshape(lead + (hidden_dim,))


def mlp_reference(params, input_skips, x, z):
    """Pure-JAX f32 reference matching the PyTorch forward.

    Note: concat is skipped at layer 0 to stay consistent with module
    construction (PyTorch builds layer 0 with dimin=input_dim even if 0 is in
    input_skips, so concatenating there would shape-error in PyTorch too).
    """
    skips = set(input_skips)
    y = x
    for li, (w, b) in enumerate(params):
        if li in skips and li != 0:
            y = jnp.concatenate([y, z], axis=-1)
        y = jnp.maximum(jnp.dot(y, w) + b, 0.0)
    return y


# ---------------------------------- main ------------------------------------ #

if __name__ == "__main__":
    n_layers = 4
    input_dim = 32
    output_dim = 32      # unused, as in the reference module
    skip_dim = 16
    hidden_dim = 32
    input_skips = (2,)

    batch, seq = 2, 8    # leading dims -> M = 16 rows in-kernel

    key = jax.random.PRNGKey(0)
    kp, kx, kz = jax.random.split(key, 3)

    params = init_mlp_with_input_skips(
        kp, n_layers, input_dim, output_dim, skip_dim, hidden_dim, input_skips)
    prepped = prepare_params(params, input_skips, input_dim, hidden_dim, skip_dim)

    x = jax.random.normal(kx, (batch, seq, input_dim), jnp.float32)
    z = jax.random.normal(kz, (batch, seq, skip_dim), jnp.float32)

    out = mlp_with_input_skips_forward(prepped, x, z)
    out = jax.block_until_ready(out)

    ref = mlp_reference(params, input_skips, x, z)
    assert out.shape == (batch, seq, hidden_dim)
    # bf16 MXU inputs / bf16 inter-layer activations with f32 accumulation ->
    # loosened tolerance vs the f32 reference.
    assert jnp.allclose(out, ref, atol=5e-2, rtol=5e-2), "mismatch vs reference"

    print("KERNEL_OK")
</pallas_src>

<mosaic_0001>
module attributes {stable_mosaic.version = 11 : i64} {
  func.func @kernel(%arg0: i32, %arg1: memref<16x32xf32, #tpu.memory_space<vmem>>, %arg2: memref<16x16xf32, #tpu.memory_space<vmem>>, %arg3: memref<32x128xbf16, #tpu.memory_space<vmem>>, %arg4: memref<1x128xf32, #tpu.memory_space<vmem>>, %arg5: memref<128x128xbf16, #tpu.memory_space<vmem>>, %arg6: memref<1x128xf32, #tpu.memory_space<vmem>>, %arg7: memref<128x128xbf16, #tpu.memory_space<vmem>>, %arg8: memref<16x128xbf16, #tpu.memory_space<vmem>>, %arg9: memref<1x128xf32, #tpu.memory_space<vmem>>, %arg10: memref<128x128xbf16, #tpu.memory_space<vmem>>, %arg11: memref<1x128xf32, #tpu.memory_space<vmem>>, %arg12: memref<16x128xbf16, #tpu.memory_space<vmem>>) attributes {dimension_semantics = [#tpu.dimension_semantics<parallel>], iteration_bounds = array<i64: 1>, scalar_prefetch = 0 : i64, scratch_operands = 0 : i64, tpu.core_type = #tpu.core_type<tc>, window_params = [{transform_indices = @transform_0, window_bounds = array<i64: 16, 32>}, {transform_indices = @transform_1, window_bounds = array<i64: 16, 16>}, {pipeline_mode = #tpu.pipeline_mode<synchronous>, transform_indices = @transform_2, window_bounds = array<i64: 32, 128>}, {pipeline_mode = #tpu.pipeline_mode<synchronous>, transform_indices = @transform_3, window_bounds = array<i64: 1, 128>}, {pipeline_mode = #tpu.pipeline_mode<synchronous>, transform_indices = @transform_4, window_bounds = array<i64: 128, 128>}, {pipeline_mode = #tpu.pipeline_mode<synchronous>, transform_indices = @transform_5, window_bounds = array<i64: 1, 128>}, {pipeline_mode = #tpu.pipeline_mode<synchronous>, transform_indices = @transform_6, window_bounds = array<i64: 128, 128>}, {pipeline_mode = #tpu.pipeline_mode<synchronous>, transform_indices = @transform_7, window_bounds = array<i64: 16, 128>}, {pipeline_mode = #tpu.pipeline_mode<synchronous>, transform_indices = @transform_8, window_bounds = array<i64: 1, 128>}, {pipeline_mode = #tpu.pipeline_mode<synchronous>, transform_indices = @transform_9, window_bounds = array<i64: 128, 128>}, {pipeline_mode = #tpu.pipeline_mode<synchronous>, transform_indices = @transform_10, window_bounds = array<i64: 1, 128>}, {transform_indices = @transform_11, window_bounds = array<i64: 16, 128>}]} {
    %c0 = arith.constant 0 : index
    %c0_0 = arith.constant 0 : index
    %0 = vector.load %arg1[%c0, %c0_0] : memref<16x32xf32, #tpu.memory_space<vmem>>, vector<16x32xf32>
    %1 = arith.truncf %0 : vector<16x32xf32> to vector<16x32xbf16>
    %c0_1 = arith.constant 0 : index
    %c0_2 = arith.constant 0 : index
    %2 = vector.load %arg2[%c0_1, %c0_2] : memref<16x16xf32, #tpu.memory_space<vmem>>, vector<16x16xf32>
    %3 = arith.truncf %2 : vector<16x16xf32> to vector<16x16xbf16>
    %c0_3 = arith.constant 0 : index
    %c0_4 = arith.constant 0 : index
    %4 = vector.load %arg3[%c0_3, %c0_4] : memref<32x128xbf16, #tpu.memory_space<vmem>>, vector<32x128xbf16>
    %cst = arith.constant dense<0.000000e+00> : vector<16x128xf32>
    %5 = tpu.matmul %1, %4, %cst {dimension_numbers = #tpu.dot_dimension_numbers<[1], [0], [0], [1], [0, 0, 1, 1], [], []>} : vector<16x32xbf16>, vector<32x128xbf16>, vector<16x128xf32> -> vector<16x128xf32>
    %c0_5 = arith.constant 0 : index
    %c0_6 = arith.constant 0 : index
    %6 = vector.load %arg4[%c0_5, %c0_6] : memref<1x128xf32, #tpu.memory_space<vmem>>, vector<1x128xf32>
    %7 = vector.broadcast %6 : vector<1x128xf32> to vector<16x128xf32>
    %8 = arith.addf %5, %7 : vector<16x128xf32>
    %cst_7 = arith.constant 0.000000e+00 : f32
    %9 = vector.broadcast %cst_7 : f32 to vector<16x128xf32>
    %10 = arith.maximumf %8, %9 : vector<16x128xf32>
    %11 = arith.truncf %10 : vector<16x128xf32> to vector<16x128xbf16>
    %c0_8 = arith.constant 0 : index
    %c0_9 = arith.constant 0 : index
    %12 = vector.load %arg5[%c0_8, %c0_9] : memref<128x128xbf16, #tpu.memory_space<vmem>>, vector<128x128xbf16>
    %cst_10 = arith.constant dense<0.000000e+00> : vector<16x128xf32>
    %13 = tpu.matmul %11, %12, %cst_10 {dimension_numbers = #tpu.dot_dimension_numbers<[1], [0], [0], [1], [0, 0, 1, 1], [], []>} : vector<16x128xbf16>, vector<128x128xbf16>, vector<16x128xf32> -> vector<16x128xf32>
    %c0_11 = arith.constant 0 : index
    %c0_12 = arith.constant 0 : index
    %14 = vector.load %arg6[%c0_11, %c0_12] : memref<1x128xf32, #tpu.memory_space<vmem>>, vector<1x128xf32>
    %15 = vector.broadcast %14 : vector<1x128xf32> to vector<16x128xf32>
    %16 = arith.addf %13, %15 : vector<16x128xf32>
    %cst_13 = arith.constant 0.000000e+00 : f32
    %17 = vector.broadcast %cst_13 : f32 to vector<16x128xf32>
    %18 = arith.maximumf %16, %17 : vector<16x128xf32>
    %19 = arith.truncf %18 : vector<16x128xf32> to vector<16x128xbf16>
    %c0_14 = arith.constant 0 : index
    %c0_15 = arith.constant 0 : index
    %20 = vector.load %arg7[%c0_14, %c0_15] : memref<128x128xbf16, #tpu.memory_space<vmem>>, vector<128x128xbf16>
    %cst_16 = arith.constant dense<0.000000e+00> : vector<16x128xf32>
    %21 = tpu.matmul %19, %20, %cst_16 {dimension_numbers = #tpu.dot_dimension_numbers<[1], [0], [0], [1], [0, 0, 1, 1], [], []>} : vector<16x128xbf16>, vector<128x128xbf16>, vector<16x128xf32> -> vector<16x128xf32>
    %c0_17 = arith.constant 0 : index
    %c0_18 = arith.constant 0 : index
    %22 = vector.load %arg8[%c0_17, %c0_18] : memref<16x128xbf16, #tpu.memory_space<vmem>>, vector<16x128xbf16>
    %cst_19 = arith.constant dense<0.000000e+00> : vector<16x128xf32>
    %23 = tpu.matmul %3, %22, %cst_19 {dimension_numbers = #tpu.dot_dimension_numbers<[1], [0], [0], [1], [0, 0, 1, 1], [], []>} : vector<16x16xbf16>, vector<16x128xbf16>, vector<16x128xf32> -> vector<16x128xf32>
    %24 = arith.addf %21, %23 : vector<16x128xf32>
    %c0_20 = arith.constant 0 : index
    %c0_21 = arith.constant 0 : index
    %25 = vector.load %arg9[%c0_20, %c0_21] : memref<1x128xf32, #tpu.memory_space<vmem>>, vector<1x128xf32>
    %26 = vector.broadcast %25 : vector<1x128xf32> to vector<16x128xf32>
    %27 = arith.addf %24, %26 : vector<16x128xf32>
    %cst_22 = arith.constant 0.000000e+00 : f32
    %28 = vector.broadcast %cst_22 : f32 to vector<16x128xf32>
    %29 = arith.maximumf %27, %28 : vector<16x128xf32>
    %30 = arith.truncf %29 : vector<16x128xf32> to vector<16x128xbf16>
    %c0_23 = arith.constant 0 : index
    %c0_24 = arith.constant 0 : index
    %31 = vector.load %arg10[%c0_23, %c0_24] : memref<128x128xbf16, #tpu.memory_space<vmem>>, vector<128x128xbf16>
    %cst_25 = arith.constant dense<0.000000e+00> : vector<16x128xf32>
    %32 = tpu.matmul %30, %31, %cst_25 {dimension_numbers = #tpu.dot_dimension_numbers<[1], [0], [0], [1], [0, 0, 1, 1], [], []>} : vector<16x128xbf16>, vector<128x128xbf16>, vector<16x128xf32> -> vector<16x128xf32>
    %c0_26 = arith.constant 0 : index
    %c0_27 = arith.constant 0 : index
    %33 = vector.load %arg11[%c0_26, %c0_27] : memref<1x128xf32, #tpu.memory_space<vmem>>, vector<1x128xf32>
    %34 = vector.broadcast %33 : vector<1x128xf32> to vector<16x128xf32>
    %35 = arith.addf %32, %34 : vector<16x128xf32>
    %cst_28 = arith.constant 0.000000e+00 : f32
    %36 = vector.broadcast %cst_28 : f32 to vector<16x128xf32>
    %37 = arith.maximumf %35, %36 : vector<16x128xf32>
    %38 = arith.truncf %37 : vector<16x128xf32> to vector<16x128xbf16>
    %c0_29 = arith.constant 0 : index
    %c0_30 = arith.constant 0 : index
    %39 = vector.load %arg12[%c0_29, %c0_30] : memref<16x128xbf16, #tpu.memory_space<vmem>>, vector<16x128xbf16>
    tpu.vector_store %arg12[%c0_29, %c0_30], %38 {strides = array<i32>} : memref<16x128xbf16, #tpu.memory_space<vmem>>, vector<16x128xbf16>,
    return
  }
  func.func @transform_0(%arg0: i32) -> (i32, i32) {
    %c0_i32 = arith.constant 0 : i32
    %c0_i32_0 = arith.constant 0 : i32
    return %arg0, %c0_i32 : i32, i32
  }
  func.func @transform_1(%arg0: i32) -> (i32, i32) {
    %c0_i32 = arith.constant 0 : i32
    %c0_i32_0 = arith.constant 0 : i32
    return %arg0, %c0_i32 : i32, i32
  }
  func.func @transform_2(%arg0: i32) -> (i32, i32) {
    %c0_i32 = arith.constant 0 : i32
    %c0_i32_0 = arith.constant 0 : i32
    %c0_i32_1 = arith.constant 0 : i32
    return %c0_i32, %c0_i32_0 : i32, i32
  }
  func.func @transform_3(%arg0: i32) -> (i32, i32) {
    %c0_i32 = arith.constant 0 : i32
    %c0_i32_0 = arith.constant 0 : i32
    %c0_i32_1 = arith.constant 0 : i32
    return %c0_i32, %c0_i32_0 : i32, i32
  }
  func.func @transform_4(%arg0: i32) -> (i32, i32) {
    %c0_i32 = arith.constant 0 : i32
    %c0_i32_0 = arith.constant 0 : i32
    %c0_i32_1 = arith.constant 0 : i32
    return %c0_i32, %c0_i32_0 : i32, i32
  }
  func.func @transform_5(%arg0: i32) -> (i32, i32) {
    %c0_i32 = arith.constant 0 : i32
    %c0_i32_0 = arith.constant 0 : i32
    %c0_i32_1 = arith.constant 0 : i32
    return %c0_i32, %c0_i32_0 : i32, i32
  }
  func.func @transform_6(%arg0: i32) -> (i32, i32) {
    %c0_i32 = arith.constant 0 : i32
    %c0_i32_0 = arith.constant 0 : i32
    %c0_i32_1 = arith.constant 0 : i32
    return %c0_i32, %c0_i32_0 : i32, i32
  }
  func.func @transform_7(%arg0: i32) -> (i32, i32) {
    %c0_i32 = arith.constant 0 : i32
    %c0_i32_0 = arith.constant 0 : i32
    %c0_i32_1 = arith.constant 0 : i32
    return %c0_i32, %c0_i32_0 : i32, i32
  }
  func.func @transform_8(%arg0: i32) -> (i32, i32) {
    %c0_i32 = arith.constant 0 : i32
    %c0_i32_0 = arith.constant 0 : i32
    %c0_i32_1 = arith.constant 0 : i32
    return %c0_i32, %c0_i32_0 : i32, i32
  }
  func.func @transform_9(%arg0: i32) -> (i32, i32) {
    %c0_i32 = arith.constant 0 : i32
    %c0_i32_0 = arith.constant 0 : i32
    %c0_i32_1 = arith.constant 0 : i32
    return %c0_i32, %c0_i32_0 : i32, i32
  }
  func.func @transform_10(%arg0: i32) -> (i32, i32) {
    %c0_i32 = arith.constant 0 : i32
    %c0_i32_0 = arith.constant 0 : i32
    %c0_i32_1 = arith.constant 0 : i32
    return %c0_i32, %c0_i32_0 : i32, i32
  }
  func.func @transform_11(%arg0: i32) -> (i32, i32) {
    %c0_i32 = arith.constant 0 : i32
    %c0_i32_0 = arith.constant 0 : i32
    return %arg0, %c0_i32 : i32, i32
  }
}

module attributes {stable_mosaic.version = 11 : i64} {
  func.func @kernel(%arg0: i32, %arg1: memref<16x32xf32, #tpu.memory_space<vmem>>, %arg2: memref<16x16xf32, #tpu.memory_space<vmem>>, %arg3: memref<32x128xbf16, #tpu.memory_space<vmem>>, %arg4: memref<1x128xf32, #tpu.memory_space<vmem>>, %arg5: memref<128x128xbf16, #tpu.memory_space<vmem>>, %arg6: memref<1x128xf32, #tpu.memory_space<vmem>>, %arg7: memref<128x128xbf16, #tpu.memory_space<vmem>>, %arg8: memref<16x128xbf16, #tpu.memory_space<vmem>>, %arg9: memref<1x128xf32, #tpu.memory_space<vmem>>, %arg10: memref<128x128xbf16, #tpu.memory_space<vmem>>, %arg11: memref<1x128xf32, #tpu.memory_space<vmem>>, %arg12: memref<16x128xbf16, #tpu.memory_space<vmem>>) attributes {dimension_semantics = [#tpu.dimension_semantics<parallel>], iteration_bounds = array<i64: 1>, scalar_prefetch = 0 : i64, scratch_operands = 0 : i64, tpu.core_type = #tpu.core_type<tc>, window_params = [{transform_indices = @transform_0, window_bounds = array<i64: 16, 32>}, {transform_indices = @transform_1, window_bounds = array<i64: 16, 16>}, {pipeline_mode = #tpu.pipeline_mode<synchronous>, transform_indices = @transform_2, window_bounds = array<i64: 32, 128>}, {pipeline_mode = #tpu.pipeline_mode<synchronous>, transform_indices = @transform_3, window_bounds = array<i64: 1, 128>}, {pipeline_mode = #tpu.pipeline_mode<synchronous>, transform_indices = @transform_4, window_bounds = array<i64: 128, 128>}, {pipeline_mode = #tpu.pipeline_mode<synchronous>, transform_indices = @transform_5, window_bounds = array<i64: 1, 128>}, {pipeline_mode = #tpu.pipeline_mode<synchronous>, transform_indices = @transform_6, window_bounds = array<i64: 128, 128>}, {pipeline_mode = #tpu.pipeline_mode<synchronous>, transform_indices = @transform_7, window_bounds = array<i64: 16, 128>}, {pipeline_mode = #tpu.pipeline_mode<synchronous>, transform_indices = @transform_8, window_bounds = array<i64: 1, 128>}, {pipeline_mode = #tpu.pipeline_mode<synchronous>, transform_indices = @transform_9, window_bounds = array<i64: 128, 128>}, {pipeline_mode = #tpu.pipeline_mode<synchronous>, transform_indices = @transform_10, window_bounds = array<i64: 1, 128>}, {transform_indices = @transform_11, window_bounds = array<i64: 16, 128>}]} {
    %c0 = arith.constant 0 : index
    %c0_0 = arith.constant 0 : index
    %0 = vector.load %arg1[%c0, %c0_0] : memref<16x32xf32, #tpu.memory_space<vmem>>, vector<16x32xf32>
    %1 = arith.truncf %0 : vector<16x32xf32> to vector<16x32xbf16>
    %c0_1 = arith.constant 0 : index
    %c0_2 = arith.constant 0 : index
    %2 = vector.load %arg2[%c0_1, %c0_2] : memref<16x16xf32, #tpu.memory_space<vmem>>, vector<16x16xf32>
    %3 = arith.truncf %2 : vector<16x16xf32> to vector<16x16xbf16>
    %c0_3 = arith.constant 0 : index
    %c0_4 = arith.constant 0 : index
    %4 = vector.load %arg3[%c0_3, %c0_4] : memref<32x128xbf16, #tpu.memory_space<vmem>>, vector<32x128xbf16>
    %cst = arith.constant dense<0.000000e+00> : vector<16x128xf32>
    %5 = tpu.matmul %1, %4, %cst {dimension_numbers = #tpu.dot_dimension_numbers<[1], [0], [0], [1], [0, 0, 1, 1], [], []>} : vector<16x32xbf16>, vector<32x128xbf16>, vector<16x128xf32> -> vector<16x128xf32>
    %c0_5 = arith.constant 0 : index
    %c0_6 = arith.constant 0 : index
    %6 = vector.load %arg4[%c0_5, %c0_6] : memref<1x128xf32, #tpu.memory_space<vmem>>, vector<1x128xf32>
    %7 = vector.broadcast %6 : vector<1x128xf32> to vector<16x128xf32>
    %8 = arith.addf %5, %7 : vector<16x128xf32>
    %cst_7 = arith.constant 0.000000e+00 : f32
    %9 = vector.broadcast %cst_7 : f32 to vector<16x128xf32>
    %10 = arith.maximumf %8, %9 : vector<16x128xf32>
    %11 = arith.truncf %10 : vector<16x128xf32> to vector<16x128xbf16>
    %c0_8 = arith.constant 0 : index
    %c0_9 = arith.constant 0 : index
    %12 = vector.load %arg5[%c0_8, %c0_9] : memref<128x128xbf16, #tpu.memory_space<vmem>>, vector<128x128xbf16>
    %cst_10 = arith.constant dense<0.000000e+00> : vector<16x128xf32>
    %13 = tpu.matmul %11, %12, %cst_10 {dimension_numbers = #tpu.dot_dimension_numbers<[1], [0], [0], [1], [0, 0, 1, 1], [], []>} : vector<16x128xbf16>, vector<128x128xbf16>, vector<16x128xf32> -> vector<16x128xf32>
    %c0_11 = arith.constant 0 : index
    %c0_12 = arith.constant 0 : index
    %14 = vector.load %arg6[%c0_11, %c0_12] : memref<1x128xf32, #tpu.memory_space<vmem>>, vector<1x128xf32>
    %15 = vector.broadcast %14 : vector<1x128xf32> to vector<16x128xf32>
    %16 = arith.addf %13, %15 : vector<16x128xf32>
    %cst_13 = arith.constant 0.000000e+00 : f32
    %17 = vector.broadcast %cst_13 : f32 to vector<16x128xf32>
    %18 = arith.maximumf %16, %17 : vector<16x128xf32>
    %19 = arith.truncf %18 : vector<16x128xf32> to vector<16x128xbf16>
    %c0_14 = arith.constant 0 : index
    %c0_15 = arith.constant 0 : index
    %20 = vector.load %arg7[%c0_14, %c0_15] : memref<128x128xbf16, #tpu.memory_space<vmem>>, vector<128x128xbf16>
    %cst_16 = arith.constant dense<0.000000e+00> : vector<16x128xf32>
    %21 = tpu.matmul %19, %20, %cst_16 {dimension_numbers = #tpu.dot_dimension_numbers<[1], [0], [0], [1], [0, 0, 1, 1], [], []>} : vector<16x128xbf16>, vector<128x128xbf16>, vector<16x128xf32> -> vector<16x128xf32>
    %c0_17 = arith.constant 0 : index
    %c0_18 = arith.constant 0 : index
    %22 = vector.load %arg8[%c0_17, %c0_18] : memref<16x128xbf16, #tpu.memory_space<vmem>>, vector<16x128xbf16>
    %cst_19 = arith.constant dense<0.000000e+00> : vector<16x128xf32>
    %23 = tpu.matmul %3, %22, %cst_19 {dimension_numbers = #tpu.dot_dimension_numbers<[1], [0], [0], [1], [0, 0, 1, 1], [], []>} : vector<16x16xbf16>, vector<16x128xbf16>, vector<16x128xf32> -> vector<16x128xf32>
    %24 = arith.addf %21, %23 : vector<16x128xf32>
    %c0_20 = arith.constant 0 : index
    %c0_21 = arith.constant 0 : index
    %25 = vector.load %arg9[%c0_20, %c0_21] : memref<1x128xf32, #tpu.memory_space<vmem>>, vector<1x128xf32>
    %26 = vector.broadcast %25 : vector<1x128xf32> to vector<16x128xf32>
    %27 = arith.addf %24, %26 : vector<16x128xf32>
    %cst_22 = arith.constant 0.000000e+00 : f32
    %28 = vector.broadcast %cst_22 : f32 to vector<16x128xf32>
    %29 = arith.maximumf %27, %28 : vector<16x128xf32>
    %30 = arith.truncf %29 : vector<16x128xf32> to vector<16x128xbf16>
    %c0_23 = arith.constant 0 : index
    %c0_24 = arith.constant 0 : index
    %31 = vector.load %arg10[%c0_23, %c0_24] : memref<128x128xbf16, #tpu.memory_space<vmem>>, vector<128x128xbf16>
    %cst_25 = arith.constant dense<0.000000e+00> : vector<16x128xf32>
    %32 = tpu.matmul %30, %31, %cst_25 {dimension_numbers = #tpu.dot_dimension_numbers<[1], [0], [0], [1], [0, 0, 1, 1], [], []>} : vector<16x128xbf16>, vector<128x128xbf16>, vector<16x128xf32> -> vector<16x128xf32>
    %c0_26 = arith.constant 0 : index
    %c0_27 = arith.constant 0 : index
    %33 = vector.load %arg11[%c0_26, %c0_27] : memref<1x128xf32, #tpu.memory_space<vmem>>, vector<1x128xf32>
    %34 = vector.broadcast %33 : vector<1x128xf32> to vector<16x128xf32>
    %35 = arith.addf %32, %34 : vector<16x128xf32>
    %cst_28 = arith.constant 0.000000e+00 : f32
    %36 = vector.broadcast %cst_28 : f32 to vector<16x128xf32>
    %37 = arith.maximumf %35, %36 : vector<16x128xf32>
    %38 = arith.truncf %37 : vector<16x128xf32> to vector<16x128xbf16>
    %c0_29 = arith.constant 0 : index
    %c0_30 = arith.constant 0 : index
    %39 = vector.load %arg12[%c0_29, %c0_30] : memref<16x128xbf16, #tpu.memory_space<vmem>>, vector<16x128xbf16>
    tpu.vector_store %arg12[%c0_29, %c0_30], %38 {strides = array<i32>} : memref<16x128xbf16, #tpu.memory_space<vmem>>, vector<16x128xbf16>,
    return
  }
  func.func @transform_0(%arg0: i32) -> (i32, i32) {
    %c0_i32 = arith.constant 0 : i32
    %c0_i32_0 = arith.constant 0 : i32
    return %arg0, %c0_i32 : i32, i32
  }
  func.func @transform_1(%arg0: i32) -> (i32, i32) {
    %c0_i32 = arith.constant 0 : i32
    %c0_i32_0 = arith.constant 0 : i32
    return %arg0, %c0_i32 : i32, i32
  }
  func.func @transform_2(%arg0: i32) -> (i32, i32) {
    %c0_i32 = arith.constant 0 : i32
    %c0_i32_0 = arith.constant 0 : i32
    %c0_i32_1 = arith.constant 0 : i32
    return %c0_i32, %c0_i32_0 : i32, i32
  }
  func.func @transform_3(%arg0: i32) -> (i32, i32) {
    %c0_i32 = arith.constant 0 : i32
    %c0_i32_0 = arith.constant 0 : i32
    %c0_i32_1 = arith.constant 0 : i32
    return %c0_i32, %c0_i32_0 : i32, i32
  }
  func.func @transform_4(%arg0: i32) -> (i32, i32) {
    %c0_i32 = arith.constant 0 : i32
    %c0_i32_0 = arith.constant 0 : i32
    %c0_i32_1 = arith.constant 0 : i32
    return %c0_i32, %c0_i32_0 : i32, i32
  }
  func.func @transform_5(%arg0: i32) -> (i32, i32) {
    %c0_i32 = arith.constant 0 : i32
    %c0_i32_0 = arith.constant 0 : i32
    %c0_i32_1 = arith.constant 0 : i32
    return %c0_i32, %c0_i32_0 : i32, i32
  }
  func.func @transform_6(%arg0: i32) -> (i32, i32) {
    %c0_i32 = arith.constant 0 : i32
    %c0_i32_0 = arith.constant 0 : i32
    %c0_i32_1 = arith.constant 0 : i32
    return %c0_i32, %c0_i32_0 : i32, i32
  }
  func.func @transform_7(%arg0: i32) -> (i32, i32) {
    %c0_i32 = arith.constant 0 : i32
    %c0_i32_0 = arith.constant 0 : i32
    %c0_i32_1 = arith.constant 0 : i32
    return %c0_i32, %c0_i32_0 : i32, i32
  }
  func.func @transform_8(%arg0: i32) -> (i32, i32) {
    %c0_i32 = arith.constant 0 : i32
    %c0_i32_0 = arith.constant 0 : i32
    %c0_i32_1 = arith.constant 0 : i32
    return %c0_i32, %c0_i32_0 : i32, i32
  }
  func.func @transform_9(%arg0: i32) -> (i32, i32) {
    %c0_i32 = arith.constant 0 : i32
    %c0_i32_0 = arith.constant 0 : i32
    %c0_i32_1 = arith.constant 0 : i32
    return %c0_i32, %c0_i32_0 : i32, i32
  }
  func.func @transform_10(%arg0: i32) -> (i32, i32) {
    %c0_i32 = arith.constant 0 : i32
    %c0_i32_0 = arith.constant 0 : i32
    %c0_i32_1 = arith.constant 0 : i32
    return %c0_i32, %c0_i32_0 : i32, i32
  }
  func.func @transform_11(%arg0: i32) -> (i32, i32) {
    %c0_i32 = arith.constant 0 : i32
    %c0_i32_0 = arith.constant 0 : i32
    return %arg0, %c0_i32 : i32, i32
  }
}

</mosaic_0001>

<bundles_post_ra>
// kernel: tpu_custom_call.1
= control target key start
LH: loop header
LB: loop body
LE: loop exit
PB: predicated region body
PF: predicated region fallthrough
CT: control target
= control target key end

     0   :  { %16 = vsyncpa [#allocation3], 0  ;;  %s1451_s0 = inlined_call_operand.hbm [shape: f32[16,32], index: 0, kind: input, shape index: {}]   ;;  %s1452_s1 = inlined_call_operand.hbm [shape: f32[16,16], index: 1, kind: input, shape index: {}]   ;;  %s1453_s2 = inlined_call_operand.hbm [shape: bf16[32,128], index: 2, kind: input, shape index: {}]   ;;  %s1454_s3 = inlined_call_operand.hbm [shape: f32[1,128], index: 3, kind: input, shape index: {}]   ;;  %s1455_s4 = inlined_call_operand.hbm [shape: bf16[128,128], index: 4, kind: input, shape index: {}]   ;;  %s1456_s5 = inlined_call_operand.hbm [shape: f32[1,128], index: 5, kind: input, shape index: {}]   ;;  %s1457_s6 = inlined_call_operand.hbm [shape: bf16[128,128], index: 6, kind: input, shape index: {}]   ;;  %s1458_s7 = inlined_call_operand.hbm [shape: bf16[16,128], index: 7, kind: input, shape index: {}]   ;;  %s1459_s8 = inlined_call_operand.hbm [shape: f32[1,128], index: 8, kind: input, shape index: {}]   ;;  %s1460_s9 = inlined_call_operand.hbm [shape: bf16[128,128], index: 9, kind: input, shape index: {}]   ;;  %s1461_s10 = inlined_call_operand.hbm [shape: f32[1,128], index: 10, kind: input, shape index: {}]   ;;  %s1462_s11 = inlined_call_operand.hbm [shape: bf16[16,128], index: 11, kind: output, shape index: {}]  }
   0x1   :  { %17 = vsyncpa [#allocation6], 0 }
   0x2   :  { %18 = vsyncpa [#allocation9], 0 }
   0x3   :  { %19 = vsyncpa [#allocation12], 0 }
   0x4   :  { %20 = vsyncpa [#allocation15], 0 }
   0x5   :  { %21 = vsyncpa [#allocation18], 0 }
   0x6   :  { %22 = vsyncpa [#allocation4], 0  ;;  %s1160_s17 = smov [#allocation5]   ;;  %s1161_s19 = smov [#allocation8]  }
   0x7   :  { %s40_s18 = sshll.u32 %s1160_s17, 4  ;;  %s65_s20 = sshll.u32 %s1161_s19, 4  ;;  %s41_s18 = int_to_ptr.vmem [resolvable:$true] %s40_s18  ;;  %s1238_s20 = int_to_ptr.vmem [resolvable:$true] %s65_s20 }
   0x8   :  { %s882_s23 = scalar_lea.hbm %s1452_s1, 256 }
   0x9   :  { %p883_p0 = scmp.ne.s32.totalorder %s1452_s1, %s882_s23  ;;  %p886_p1 = scmp.lt.u32.totalorder %s882_s23, %s1452_s1 }
   0xb   :  { %p888_p2 = pnand %p886_p1, %p883_p0 }
   0xd   :  { %891 = shalt.err (!%p888_p2)
}
   0xe   :  { %s892_s28 = scalar_lea.vmem %s41_s18, 256  ;;  %p897_p4 = scmp.lt.s32.totalorder %s41_s18, %s41_s18 }
   0xf   :  { %p893_p3 = scmp.ne.s32.totalorder %s41_s18, %s892_s28  ;;  %p898_p5 = scmp.lt.s32.totalorder %s892_s28, %s892_s28 }
  0x11   :  { %p899_p6 = por %p898_p5, %p897_p4 }
  0x13   :  { %p900_p7 = pnand %p899_p6, %p893_p3 }
  0x15   :  { %903 = shalt.err (!%p900_p7)
}
  0x16   :  { %s1162_s29 = smov 128   ;;  %s1163_s30 = smov 8  }
  0x17   :  { %46 = dma.hbm_to_vmem [thread:$0]  %s1452_s1, 256, %s41_s18, [#allocation6], %s1162_s29, %s1162_s29, %s1163_s30  }
  0x18   :  { %s904_s16 = scalar_lea.hbm %s1454_s3, 16 }
  0x19   :  { %p905_p8 = scmp.ne.s32.totalorder %s1454_s3, %s904_s16  ;;  %p908_p9 = scmp.lt.u32.totalorder %s904_s16, %s1454_s3 }
  0x1b   :  { %p910_p10 = pnand %p908_p9, %p905_p8 }
  0x1d   :  { %913 = shalt.err (!%p910_p10)
}
  0x1e   :  { %s914_s23 = scalar_lea.vmem %s1238_s20, 16  ;;  %s918_s1 = scalar_lea.vmem %s1238_s20, 32 }
  0x1f   :  { %p915_p11 = scmp.ne.s32.totalorder %s1238_s20, %s914_s23  ;;  %p919_p12 = scmp.lt.s32.totalorder %s1238_s20, %s1238_s20 }
  0x20   :  { %p920_p13 = scmp.lt.s32.totalorder %s918_s1, %s914_s23 }
  0x22   :  { %p921_p0 = por %p920_p13, %p919_p12 }
  0x24   :  { %p922_p1 = pnand %p921_p0, %p915_p11 }
  0x26   :  { %925 = shalt.err (!%p922_p1)
}
  0x27   :  { %68 = dma.hbm_to_vmem [thread:$0]  %s1454_s3, 16, %s1238_s20, [#allocation9]  }
  0x28   :  { %s1164_s25 = smov [#allocation11]   ;;  %s926_s12 = scalar_lea.hbm %s1456_s5, 16 }
  0x29   :  { %s87_s26 = sshll.u32 %s1164_s25, 4  ;;  %p927_p2 = scmp.ne.s32.totalorder %s1456_s5, %s926_s12  ;;  %s88_s26 = int_to_ptr.vmem [resolvable:$true] %s87_s26 }
  0x2a   :  { %p930_p3 = scmp.lt.u32.totalorder %s926_s12, %s1456_s5 }
  0x2c   :  { %p932_p4 = pnand %p930_p3, %p927_p2 }
  0x2e   :  { %935 = shalt.err (!%p932_p4)
}
  0x2f   :  { %s936_s17 = scalar_lea.vmem %s88_s26, 16  ;;  %s940_s3 = scalar_lea.vmem %s88_s26, 32 }
  0x30   :  { %p937_p5 = scmp.ne.s32.totalorder %s88_s26, %s936_s17  ;;  %p941_p6 = scmp.lt.s32.totalorder %s88_s26, %s88_s26 }
  0x31   :  { %p942_p7 = scmp.lt.s32.totalorder %s940_s3, %s936_s17 }
  0x33   :  { %p943_p8 = por %p942_p7, %p941_p6 }
  0x35   :  { %p944_p9 = pnand %p943_p8, %p937_p5 }
  0x37   :  { %947 = shalt.err (!%p944_p9)
}
  0x38   :  { %90 = dma.hbm_to_vmem [thread:$0]  %s1456_s5, 16, %s88_s26, [#allocation12]  }
  0x39   :  { %s1165_s21 = smov [#allocation14]   ;;  %s1166_s23 = smov [#allocation17]  }
  0x3a   :  { %s108_s22 = sshll.u32 %s1165_s21, 4  ;;  %s130_s1 = sshll.u32 %s1166_s23, 4  ;;  %s109_s22 = int_to_ptr.vmem [resolvable:$true] %s108_s22  ;;  %s131_s1 = int_to_ptr.vmem [resolvable:$true] %s130_s1 }
  0x3b   :  { %s948_s25 = scalar_lea.hbm %s1458_s7, 128 }
  0x3c   :  { %p949_p10 = scmp.ne.s32.totalorder %s1458_s7, %s948_s25  ;;  %p952_p11 = scmp.lt.u32.totalorder %s948_s25, %s1458_s7 }
  0x3e   :  { %p954_p12 = pnand %p952_p11, %p949_p10 }
  0x40   :  { %957 = shalt.err (!%p954_p12)
}
  0x41   :  { %s958_s5 = scalar_lea.vmem %s109_s22, 128  ;;  %p963_p0 = scmp.lt.s32.totalorder %s109_s22, %s109_s22 }
  0x42   :  { %p959_p13 = scmp.ne.s32.totalorder %s109_s22, %s958_s5  ;;  %p964_p1 = scmp.lt.s32.totalorder %s958_s5, %s958_s5 }
  0x44   :  { %p965_p2 = por %p964_p1, %p963_p0 }
  0x46   :  { %p966_p3 = pnand %p965_p2, %p959_p13 }
  0x48   :  { %969 = shalt.err (!%p966_p3)
}
  0x49   :  { %s1167_s26 = smov 64   ;;  %s1168_s14 = smov 4  }
  0x4a   :  { %114 = dma.hbm_to_vmem [thread:$0]  %s1458_s7, 128, %s109_s22, [#allocation15], %s1167_s26, %s1167_s26, %s1168_s14  }
  0x4b   :  { %s970_s20 = scalar_lea.hbm %s1460_s9, 1024 }
  0x4c   :  { %p971_p4 = scmp.ne.s32.totalorder %s1460_s9, %s970_s20  ;;  %p974_p5 = scmp.lt.u32.totalorder %s970_s20, %s1460_s9 }
  0x4e   :  { %p976_p6 = pnand %p974_p5, %p971_p4 }
  0x50   :  { %979 = shalt.err (!%p976_p6)
}
  0x51   :  { %s980_s24 = scalar_lea.vmem %s131_s1, 1024  ;;  %p985_p8 = scmp.lt.s32.totalorder %s131_s1, %s131_s1 }
  0x52   :  { %p981_p7 = scmp.ne.s32.totalorder %s131_s1, %s980_s24  ;;  %p986_p9 = scmp.lt.s32.totalorder %s980_s24, %s980_s24 }
  0x54   :  { %p987_p10 = por %p986_p9, %p985_p8 }
  0x56   :  { %p988_p11 = pnand %p987_p10, %p981_p7 }
  0x58   :  { %991 = shalt.err (!%p988_p11)
}
  0x59   :  { %136 = dma.hbm_to_vmem [thread:$0]  %s1460_s9, 1024, %s131_s1, [#allocation18], %s1167_s26, %s1167_s26, %s1168_s14  }
  0x5a   :  { %s1169_s25 = smov [#allocation2]   ;;  %s1170_s28 = smov [#allocation7]  }
  0x5b   :  { %s28_s27 = sshll.u32 %s1169_s25, 4  ;;  %s52_s12 = sshll.u32 %s1170_s28, 4  ;;  %s29_s27 = int_to_ptr.vmem [resolvable:$true] %s28_s27  ;;  %s53_s12 = int_to_ptr.vmem [resolvable:$true] %s52_s12 }
  0x5c   :  { %s992_s15 = scalar_lea.hbm %s1451_s0, 256 }
  0x5d   :  { %p993_p12 = scmp.ne.s32.totalorder %s1451_s0, %s992_s15  ;;  %p996_p13 = scmp.lt.u32.totalorder %s992_s15, %s1451_s0 }
  0x5f   :  { %p998_p0 = pnand %p996_p13, %p993_p12 }
  0x61   :  { %1001 = shalt.err (!%p998_p0)
}
  0x62   :  { %s1002_s9 = scalar_lea.vmem %s29_s27, 256  ;;  %p1007_p2 = scmp.lt.s32.totalorder %s29_s27, %s29_s27 }
  0x63   :  { %p1003_p1 = scmp.ne.s32.totalorder %s29_s27, %s1002_s9  ;;  %p1008_p3 = scmp.lt.s32.totalorder %s1002_s9, %s1002_s9 }
  0x65   :  { %p1009_p4 = por %p1008_p3, %p1007_p2 }
  0x67   :  { %p1010_p5 = pnand %p1009_p4, %p1003_p1 }
  0x69   :  { %1013 = shalt.err (!%p1010_p5)
}
  0x6a   :  { %34 = dma.hbm_to_vmem [thread:$0]  %s1451_s0, 256, %s29_s27, [#allocation3], %s1162_s29, %s1162_s29, %s1163_s30  }
  0x6b   :  { %s1014_s18 = scalar_lea.hbm %s1453_s2, 256 }
  0x6c   :  { %p1015_p6 = scmp.ne.s32.totalorder %s1453_s2, %s1014_s18  ;;  %p1018_p7 = scmp.lt.u32.totalorder %s1014_s18, %s1453_s2 }
  0x6e   :  { %p1020_p8 = pnand %p1018_p7, %p1015_p6 }
  0x70   :  { %1023 = shalt.err (!%p1020_p8)
}
  0x71   :  { %s1024_s28 = scalar_lea.vmem %s53_s12, 256  ;;  %p1029_p10 = scmp.lt.s32.totalorder %s53_s12, %s53_s12 }
  0x72   :  { %p1025_p9 = scmp.ne.s32.totalorder %s53_s12, %s1024_s28  ;;  %p1030_p11 = scmp.lt.s32.totalorder %s1024_s28, %s1024_s28 }
  0x74   :  { %p1031_p12 = por %p1030_p11, %p1029_p10 }
  0x76   :  { %p1032_p13 = pnand %p1031_p12, %p1025_p9 }
  0x78   :  { %1035 = shalt.err (!%p1032_p13)
}
  0x79   :  { %58 = dma.hbm_to_vmem [thread:$0]  %s1453_s2, 256, %s53_s12, [#allocation6], %s1167_s26, %s1167_s26, %s1168_s14  }
  0x7a   :  { %s1171_s30 = smov [#allocation10]   ;;  %s1172_s13 = smov [#allocation13]  }
  0x7b   :  { %s74_s27 = sshll.u32 %s1171_s30, 4  ;;  %s96_s5 = sshll.u32 %s1172_s13, 4  ;;  %s75_s27 = int_to_ptr.vmem [resolvable:$true] %s74_s27  ;;  %s97_s5 = int_to_ptr.vmem [resolvable:$true] %s96_s5 }
  0x7c   :  { %s1036_s17 = scalar_lea.hbm %s1455_s4, 1024 }
  0x7d   :  { %p1037_p0 = scmp.ne.s32.totalorder %s1455_s4, %s1036_s17  ;;  %p1040_p1 = scmp.lt.u32.totalorder %s1036_s17, %s1455_s4 }
  0x7f   :  { %p1042_p2 = pnand %p1040_p1, %p1037_p0 }
  0x81   :  { %1045 = shalt.err (!%p1042_p2)
}
  0x82   :  { %s1046_s2 = scalar_lea.vmem %s75_s27, 1024  ;;  %p1051_p4 = scmp.lt.s32.totalorder %s75_s27, %s75_s27 }
  0x83   :  { %p1047_p3 = scmp.ne.s32.totalorder %s75_s27, %s1046_s2  ;;  %p1052_p5 = scmp.lt.s32.totalorder %s1046_s2, %s1046_s2 }
  0x85   :  { %p1053_p6 = por %p1052_p5, %p1051_p4 }
  0x87   :  { %p1054_p7 = pnand %p1053_p6, %p1047_p3 }
  0x89   :  { %1057 = shalt.err (!%p1054_p7)
}
  0x8a   :  { %80 = dma.hbm_to_vmem [thread:$0]  %s1455_s4, 1024, %s75_s27, [#allocation9], %s1167_s26, %s1167_s26, %s1168_s14  }
  0x8b   :  { %s1058_s18 = scalar_lea.hbm %s1457_s6, 1024 }
  0x8c   :  { %p1059_p8 = scmp.ne.s32.totalorder %s1457_s6, %s1058_s18  ;;  %p1062_p9 = scmp.lt.u32.totalorder %s1058_s18, %s1457_s6 }
  0x8e   :  { %p1064_p10 = pnand %p1062_p9, %p1059_p8 }
  0x90   :  { %1067 = shalt.err (!%p1064_p10)
}
  0x91   :  { %s1068_s28 = scalar_lea.vmem %s97_s5, 1024  ;;  %p1073_p12 = scmp.lt.s32.totalorder %s97_s5, %s97_s5 }
  0x92   :  { %p1069_p11 = scmp.ne.s32.totalorder %s97_s5, %s1068_s28  ;;  %p1074_p13 = scmp.lt.s32.totalorder %s1068_s28, %s1068_s28 }
  0x94   :  { %p1075_p0 = por %p1074_p13, %p1073_p12 }
  0x96   :  { %p1076_p1 = pnand %p1075_p0, %p1069_p11 }
  0x98   :  { %1079 = shalt.err (!%p1076_p1)
}
  0x99   :  { %102 = dma.hbm_to_vmem [thread:$0]  %s1457_s6, 1024, %s97_s5, [#allocation12], %s1167_s26, %s1167_s26, %s1168_s14  }
  0x9a   :  { %s1173_s29 = smov [#allocation16]   ;;  %s1174_s27 = smov [#allocation19]  }
  0x9b   :  { %s121_s30 = sshll.u32 %s1173_s29, 4  ;;  %s143_s13 = sshll.u32 %s1174_s27, 4  ;;  %s122_s30 = int_to_ptr.vmem [resolvable:$true] %s121_s30  ;;  %s144_s13 = int_to_ptr.vmem [resolvable:$true] %s143_s13 }
  0x9c   :  { %s1080_s17 = scalar_lea.hbm %s1459_s8, 16 }
  0x9d   :  { %p1081_p2 = scmp.ne.s32.totalorder %s1459_s8, %s1080_s17  ;;  %p1084_p3 = scmp.lt.u32.totalorder %s1080_s17, %s1459_s8 }
  0x9f   :  { %p1086_p4 = pnand %p1084_p3, %p1081_p2 }
  0xa1   :  { %1089 = shalt.err (!%p1086_p4)
}
  0xa2   :  { %s1090_s6 = scalar_lea.vmem %s122_s30, 16  ;;  %s1094_s5 = scalar_lea.vmem %s122_s30, 32 }
  0xa3   :  { %p1091_p5 = scmp.ne.s32.totalorder %s122_s30, %s1090_s6  ;;  %p1095_p6 = scmp.lt.s32.totalorder %s122_s30, %s122_s30 }
  0xa4   :  { %p1096_p7 = scmp.lt.s32.totalorder %s1094_s5, %s1090_s6 }
  0xa6   :  { %p1097_p8 = por %p1096_p7, %p1095_p6 }
  0xa8   :  { %p1098_p9 = pnand %p1097_p8, %p1091_p5 }
  0xaa   :  { %1101 = shalt.err (!%p1098_p9)
}
  0xab   :  { %124 = dma.hbm_to_vmem [thread:$0]  %s1459_s8, 16, %s122_s30, [#allocation15]  }
  0xac   :  { %s1102_s23 = scalar_lea.hbm %s1461_s10, 16 }
  0xad   :  { %p1103_p10 = scmp.ne.s32.totalorder %s1461_s10, %s1102_s23  ;;  %p1106_p11 = scmp.lt.u32.totalorder %s1102_s23, %s1461_s10 }
  0xaf   :  { %p1108_p12 = pnand %p1106_p11, %p1103_p10 }
  0xb1   :  { %1111 = shalt.err (!%p1108_p12)
}
  0xb2   :  { %s1112_s25 = scalar_lea.vmem %s144_s13, 16  ;;  %s1116_s28 = scalar_lea.vmem %s144_s13, 32 }
  0xb3   :  { %p1113_p13 = scmp.ne.s32.totalorder %s144_s13, %s1112_s25  ;;  %p1117_p0 = scmp.lt.s32.totalorder %s144_s13, %s144_s13 }
  0xb4   :  { %p1118_p1 = scmp.lt.s32.totalorder %s1116_s28, %s1112_s25 }
  0xb6   :  { %p1119_p2 = por %p1118_p1, %p1117_p0 }
  0xb8   :  { %p1120_p3 = pnand %p1119_p2, %p1113_p13 }
  0xba   :  { %1123 = shalt.err (!%p1120_p3)
}
  0xbb   :  { %146 = dma.hbm_to_vmem [thread:$0]  %s1461_s10, 16, %s144_s13, [#allocation18]  }
  0xbc   :  { %1146 = dma.done.wait [#allocation3], 256  }
  0xbd   :  { %1147 = vsyncadd [#allocation3], 4294967040 }
  0xbe   :  { %1148 = dma.done.wait [#allocation6], 512  }
  0xbf   :  { %1149 = vsyncadd [#allocation6], 4294966784 }
  0xc0   :  { %1150 = dma.done.wait [#allocation9], 1040  }
  0xc1   :  { %1151 = vsyncadd [#allocation9], 4294966256 }
  0xc2   :  { %1152 = dma.done.wait [#allocation12], 1040  }
  0xc3   :  { %1153 = vsyncadd [#allocation12], 4294966256 }
  0xc4   :  { %1154 = dma.done.wait [#allocation15], 144  }
  0xc5   :  { %1155 = vsyncadd [#allocation15], 4294967152 }
  0xc6   :  { %1156 = dma.done.wait [#allocation18], 1040  }
  0xc7   :  { %1157 = vsyncadd [#allocation18], 4294966256  ;;  %v1175_v0 = vmov 0.0   ;;  %vm1176_vm0 = vmmov 0   ;;  %v855_v1 = vld [vmem:[#allocation7] sm:$0xff]   ;;  %v856_v2 = vld [vmem:[#allocation7 + $0x8] sm:$0xff]  }
  0xc8   :  { %763 = vmatprep.subr.bf16.mxu0 %v1175_v0  ;;  %767 = vmatprep.mubr.msk.bf16.mxu0 %vm1176_vm0, %v1175_v0  ;;  %v181_v3 = vld [vmem:[#allocation2] sm:$0xff]  ;;  %v182_v4 = vld [vmem:[#allocation2 + $0x8] sm:$0xff]  ;;  %v857_v5 = vld [vmem:[#allocation10] sm:$0xff]   ;;  %vm210_vm1 = vcmask 261120   ;;  %vm397_vm2 = vcmask 130048   ;;  %s1177_s10 = smov [#allocation20]  }
  0xc9   :  { %771 = vmatprep.subr.bf16.mxu1 %v1175_v0  ;;  %787 = vmatprep.mubr.msk.bf16.mxu1 %vm1176_vm0, %v1175_v0  ;;  %v183_v6 = vpack.c.bf16 %v182_v4, %v181_v3  ;;  %v858_v7 = vld [vmem:[#allocation10 + $0x8] sm:$0xff]   ;;  %v859_v8 = vld [vmem:[#allocation10 + $0x10] sm:$0xff]   ;;  %v860_v9 = vld [vmem:[#allocation10 + $0x18] sm:$0xff]   ;;  %s672_s0 = sshll.u32 %s1177_s10, 4  ;;  %s673_s0 = int_to_ptr.vmem [resolvable:$true] %s672_s0 }
  0xca   :  { %764 = vmatpush3.bf16.msra.mxu0 %v855_v1  ;;  %772 = vmatpush3.bf16.msra.mxu1 %v857_v5  ;;  %v861_v10 = vld [vmem:[#allocation10 + $0x20] sm:$0xff]   ;;  %v862_v11 = vld [vmem:[#allocation10 + $0x28] sm:$0xff]   ;;  %v863_v12 = vld [vmem:[#allocation10 + $0x30] sm:$0xff]   ;;  %s1124_s29 = scalar_lea.vmem %s673_s0, 128  ;;  %p1129_p5 = scmp.lt.s32.totalorder %s673_s0, %s673_s0 }
  0xcb   :  { %765 = vmatprep.subr.bf16.mxu0 %v1175_v0  ;;  %773 = vmatprep.subr.bf16.mxu1 %v1175_v0  ;;  %v864_v13 = vld [vmem:[#allocation10 + $0x38] sm:$0xff]   ;;  %v865_v14 = vld [vmem:[#allocation14] sm:$0xff]   ;;  %v867_v19 = vld [vmem:[#allocation13 + $0x8] sm:$0xff]   ;;  %p1125_p4 = scmp.ne.s32.totalorder %s673_s0, %s1124_s29  ;;  %p1130_p6 = scmp.lt.s32.totalorder %s1124_s29, %s1124_s29 }
  0xcc   :  { %v184_v15 = vld [vmem:[#allocation5] sm:$0xff]  ;;  %v185_v16 = vld [vmem:[#allocation5 + $0x8] sm:$0xff]  ;;  %v868_v20 = vld [vmem:[#allocation13 + $0x10] sm:$0xff]  }
  0xcd   :  { %v186_v17 = vpack.c.bf16 %v185_v16, %v184_v15  ;;  %v866_v18 = vld [vmem:[#allocation13] sm:$0xff]   ;;  %v869_v21 = vld [vmem:[#allocation13 + $0x18] sm:$0xff]   ;;  %v871_v23 = vld [vmem:[#allocation13 + $0x28] sm:$0xff]   ;;  %p1131_p7 = por %p1130_p6, %p1129_p5 }
  0xce   :  { %766 = vmatpush3.bf16.msra.mxu0 %v856_v2  ;;  %774 = vmatpush3.bf16.msra.mxu1 %v858_v7  ;;  %v870_v22 = vld [vmem:[#allocation13 + $0x20] sm:$0xff]   ;;  %v689_v24 = vld [vmem:[#allocation8] ss:$0 sm:$0xff]  ;;  %v872_v34 = vld [vmem:[#allocation13 + $0x30] sm:$0xff]  }
  0xcf   :  { %791 = vmatprep.subr.bf16.mxu0 %v1175_v0  ;;  %775 = vmatprep.subr.bf16.mxu1 %v1175_v0  ;;  %v873_v35 = vld [vmem:[#allocation13 + $0x38] sm:$0xff]   ;;  %v874_v37 = vld [vmem:[#allocation17] sm:$0xff]   ;;  %v877_v43 = vld [vmem:[#allocation17 + $0x18] sm:$0xff]   ;;  %p1132_p8 = pnand %p1131_p7, %p1125_p4 }
  0xd0   :  { %v875_v40 = vld [vmem:[#allocation17 + $0x8] sm:$0xff]   ;;  %v876_v42 = vld [vmem:[#allocation17 + $0x10] sm:$0xff]   ;;  %v878_v44 = vld [vmem:[#allocation17 + $0x20] sm:$0xff]  }
  0xd1   :  { %768 = vmatmul.mubr.msk.bf16.vlgmr.msra.gmra.mrb[0].mxu0 %vm210_vm1, %v183_v6  ;;  %v693_v45 = vld [vmem:[#allocation11] ss:$0 sm:$0xff]  ;;  %v879_v55 = vld [vmem:[#allocation17 + $0x28] sm:$0xff]   ;;  %v881_v57 = vld [vmem:[#allocation17 + $0x38] sm:$0xff]  }
  0xd2   :  { %793 = vmatprep.mubr.msk.bf16.mxu0 %vm1176_vm0, %v1175_v0  ;;  %776 = vmatpush3.bf16.msra.mxu1 %v859_v8  ;;  %v880_v56 = vld [vmem:[#allocation17 + $0x30] sm:$0xff]   ;;  %v712_v59 = vld [vmem:[#allocation16] ss:$0 sm:$0xff]  ;;  %v713_v7 = vld [vmem:[#allocation19] ss:$0 sm:$0xff] }
  0xd3   :  { %777 = vmatprep.subr.bf16.mxu1 %v1175_v0  ;;  %792 = vmatpush3.bf16.msra.mxu0 %v865_v14 }
  0xd4   :  { %797 = vmatprep.subr.bf16.mxu0 %v1175_v0 }
  0xd6   :  { %778 = vmatpush3.bf16.msra.mxu1 %v860_v9 }
  0xd7   :  { %779 = vmatprep.subr.bf16.mxu1 %v1175_v0 }
  0xd9   :  { %794 = vmatmul.mubr.msk.bf16.vlgmr.msra.gmra.mrb[4].mxu0 %vm397_vm2, %v186_v17 }
  0xda   :  { %780 = vmatpush3.bf16.msra.mxu1 %v861_v10  ;;  %798 = vmatpush3.bf16.msra.mxu0 %v866_v18 }
  0xdb   :  { %781 = vmatprep.subr.bf16.mxu1 %v1175_v0  ;;  %813 = vmatprep.mubr.msk.bf16.mxu0 %vm1176_vm0, %v1175_v0 }
  0xdc   :  { %799 = vmatprep.subr.bf16.mxu0 %v1175_v0 }
  0xde   :  { %782 = vmatpush3.bf16.msra.mxu1 %v862_v11  ;;  %800 = vmatpush3.bf16.msra.mxu0 %v867_v19 }
  0xdf   :  { %783 = vmatprep.subr.bf16.mxu1 %v1175_v0  ;;  %801 = vmatprep.subr.bf16.mxu0 %v1175_v0 }
  0xe2   :  { %784 = vmatpush3.bf16.msra.mxu1 %v863_v12  ;;  %802 = vmatpush3.bf16.msra.mxu0 %v868_v20 }
  0xe3   :  { %785 = vmatprep.subr.bf16.mxu1 %v1175_v0  ;;  %803 = vmatprep.subr.bf16.mxu0 %v1175_v0 }
  0xe6   :  { %786 = vmatpush3.bf16.msra.mxu1 %v864_v13  ;;  %804 = vmatpush3.bf16.msra.mxu0 %v869_v21 }
  0xe7   :  { %817 = vmatprep.subr.bf16.mxu1 %v1175_v0  ;;  %805 = vmatprep.subr.bf16.mxu0 %v1175_v0 }
  0xea   :  { %806 = vmatpush3.bf16.msra.mxu0 %v870_v22 }
  0xeb   :  { %807 = vmatprep.subr.bf16.mxu0 %v1175_v0 }
  0xee   :  { %808 = vmatpush3.bf16.msra.mxu0 %v871_v23 }
  0xef   :  { %809 = vmatprep.subr.bf16.mxu0 %v1175_v0 }
  0xf2   :  { %810 = vmatpush3.bf16.msra.mxu0 %v872_v34 }
  0xf3   :  { %811 = vmatprep.subr.bf16.mxu0 %v1175_v0 }
  0xf6   :  { %812 = vmatpush3.bf16.msra.mxu0 %v873_v35 }
 0x1a4   :  { %v248_v25 = vpop.f32.mrb[0].mxu0 }
 0x1a5   :  { %v249_v26 = vadd.f32 %v689_v24, %v248_v25  ;;  %v769_v27 = vpop.f32.mrb[1].mxu0 }
 0x1a6   :  { %v251_v28 = vpop.f32.mrb[2].mxu0 }
 0x1a7   :  { %v252_v29 = vadd.f32 %v689_v24, %v251_v28  ;;  %v770_v30 = vpop.f32.mrb[3].mxu0  ;;  %v255_v31 = vmax.f32 %v249_v26, 0.0 }
 0x1a9   :  { %v256_v32 = vmax.f32 %v252_v29, 0.0 }
 0x1ab   :  { %v257_v33 = vpack.c.bf16 %v256_v32, %v255_v31 }
 0x1ac   :  { %v435_v36 = vpop.f32.mrb[4].mxu0 }
 0x1ad   :  { %788 = vmatmul.mubr.bf16.vlgmr.msra.gmra.mrb[0].mxu1 %v257_v33  ;;  %v795_v38 = vpop.f32.mrb[5].mxu0 }
 0x1ae   :  { %833 = vmatprep.mubr.msk.bf16.mxu1 %vm1176_vm0, %v1175_v0  ;;  %v438_v39 = vpop.f32.mrb[6].mxu0  ;;  %818 = vmatpush3.bf16.msra.mxu1 %v874_v37 }
 0x1af   :  { %v796_v41 = vpop.f32.mrb[7].mxu0  ;;  %819 = vmatprep.subr.bf16.mxu1 %v1175_v0 }
 0x1b2   :  { %820 = vmatpush3.bf16.msra.mxu1 %v875_v40 }
 0x1b3   :  { %821 = vmatprep.subr.bf16.mxu1 %v1175_v0 }
 0x1b6   :  { %822 = vmatpush3.bf16.msra.mxu1 %v876_v42 }
 0x1b7   :  { %823 = vmatprep.subr.bf16.mxu1 %v1175_v0 }
 0x1ba   :  { %824 = vmatpush3.bf16.msra.mxu1 %v877_v43 }
 0x1bb   :  { %825 = vmatprep.subr.bf16.mxu1 %v1175_v0 }
 0x1be   :  { %826 = vmatpush3.bf16.msra.mxu1 %v878_v44 }
 0x1bf   :  { %827 = vmatprep.subr.bf16.mxu1 %v1175_v0 }
 0x1c2   :  { %828 = vmatpush3.bf16.msra.mxu1 %v879_v55 }
 0x1c3   :  { %829 = vmatprep.subr.bf16.mxu1 %v1175_v0 }
 0x1c6   :  { %830 = vmatpush3.bf16.msra.mxu1 %v880_v56 }
 0x1c7   :  { %831 = vmatprep.subr.bf16.mxu1 %v1175_v0 }
 0x1ca   :  { %832 = vmatpush3.bf16.msra.mxu1 %v881_v57 }
 0x280   :  { %v363_v46 = vpop.f32.mrb[0].mxu1 }
 0x281   :  { %v364_v47 = vadd.f32 %v693_v45, %v363_v46  ;;  %v789_v48 = vpop.f32.mrb[1].mxu1 }
 0x282   :  { %v366_v49 = vpop.f32.mrb[2].mxu1 }
 0x283   :  { %v367_v50 = vadd.f32 %v693_v45, %v366_v49  ;;  %v790_v51 = vpop.f32.mrb[3].mxu1  ;;  %v370_v52 = vmax.f32 %v364_v47, 0.0 }
 0x285   :  { %v371_v53 = vmax.f32 %v367_v50, 0.0 }
 0x287   :  { %v372_v54 = vpack.c.bf16 %v371_v53, %v370_v52 }
 0x289   :  { %814 = vmatmul.mubr.bf16.vlgmr.msra.gmra.mrb[8].mxu0 %v372_v54 }
 0x35c   :  { %v524_v58 = vpop.f32.mrb[8].mxu0 }
 0x35d   :  { %v525_v60 = vadd.f32 %v524_v58, %v435_v36  ;;  %v815_v61 = vpop.f32.mrb[9].mxu0 }
 0x35e   :  { %v527_v62 = vpop.f32.mrb[10].mxu0 }
 0x35f   :  { %v538_v63 = vadd.f32 %v712_v59, %v525_v60  ;;  %v528_v1 = vadd.f32 %v527_v62, %v438_v39  ;;  %v816_v2 = vpop.f32.mrb[11].mxu0 }
 0x361   :  { %v539_v3 = vadd.f32 %v712_v59, %v528_v1  ;;  %v540_v4 = vmax.f32 %v538_v63, 0.0 }
 0x363   :  { %v541_v5 = vmax.f32 %v539_v3, 0.0 }
 0x365   :  { %v542_v6 = vpack.c.bf16 %v541_v5, %v540_v4 }
 0x367   :  { %834 = vmatmul.mubr.bf16.vlgmr.msra.gmra.mrb[4].mxu1 %v542_v6 }
 0x43a   :  { %v648_v8 = vpop.f32.mrb[4].mxu1 }
 0x43b   :  { %v649_v9 = vadd.f32 %v713_v7, %v648_v8  ;;  %v835_v10 = vpop.f32.mrb[5].mxu1 }
 0x43c   :  { %v651_v0 = vpop.f32.mrb[6].mxu1 }
 0x43d   :  { %v652_v11 = vadd.f32 %v713_v7, %v651_v0  ;;  %v836_v12 = vpop.f32.mrb[7].mxu1  ;;  %v655_v13 = vmax.f32 %v649_v9, 0.0 }
 0x43f   :  { %v656_v14 = vmax.f32 %v652_v11, 0.0 }
 0x441   :  { %v729_v15 = vpack.c.bf16 %v656_v14, %v655_v13 }
 0x443   :  { %730 = vst [vmem:[#allocation20] sm:$0xff] %v729_v15  }
 0x444   :  { %1135 = shalt.err (!%p1132_p8)
}
 0x445   :  { %s1136_s13 = scalar_lea.hbm %s1462_s11, 128 }
 0x446   :  { %p1137_p9 = scmp.ne.s32.totalorder %s1462_s11, %s1136_s13  ;;  %p1140_p10 = scmp.lt.u32.totalorder %s1136_s13, %s1462_s11 }
 0x448   :  { %p1142_p11 = pnand %p1140_p10, %p1137_p9 }
 0x44a   :  { %1145 = shalt.err (!%p1142_p11)
}
 0x44b   :  { %678 = dma.vmem_to_hbm [thread:$0]  %s673_s0, 128, %s1462_s11, [#allocation4], %s1167_s26, %s1167_s26, %s1168_s14  }
 0x44c   :  { %1158 = dma.done.wait [#allocation4], 128  }
 0x44d   :  { %1159 = vsyncadd [#allocation4], 4294967168 }
 0x44e   :  { %682 = vsyncpa [#allocation3], 1 }
 0x44f   :  { %683 = vsyncpa [#allocation6], 1 }
 0x450   :  { %684 = vsyncpa [#allocation9], 1 }
 0x451   :  { %685 = vsyncpa [#allocation12], 1 }
 0x452   :  { %686 = vsyncpa [#allocation15], 1 }
 0x453   :  { %687 = vsyncpa [#allocation18], 1 }
 0x454   :  { %688 = vsyncpa [#allocation4], 1 }

// kernel: tpu_custom_call.1
= control target key start
LH: loop header
LB: loop body
LE: loop exit
PB: predicated region body
PF: predicated region fallthrough
CT: control target
= control target key end

     0   :  { %16 = vsyncpa [#allocation3], 0  ;;  %s1451_s0 = inlined_call_operand.hbm [shape: f32[16,32], index: 0, kind: input, shape index: {}]   ;;  %s1452_s1 = inlined_call_operand.hbm [shape: f32[16,16], index: 1, kind: input, shape index: {}]   ;;  %s1453_s2 = inlined_call_operand.hbm [shape: bf16[32,128], index: 2, kind: input, shape index: {}]   ;;  %s1454_s3 = inlined_call_operand.hbm [shape: f32[1,128], index: 3, kind: input, shape index: {}]   ;;  %s1455_s4 = inlined_call_operand.hbm [shape: bf16[128,128], index: 4, kind: input, shape index: {}]   ;;  %s1456_s5 = inlined_call_operand.hbm [shape: f32[1,128], index: 5, kind: input, shape index: {}]   ;;  %s1457_s6 = inlined_call_operand.hbm [shape: bf16[128,128], index: 6, kind: input, shape index: {}]   ;;  %s1458_s7 = inlined_call_operand.hbm [shape: bf16[16,128], index: 7, kind: input, shape index: {}]   ;;  %s1459_s8 = inlined_call_operand.hbm [shape: f32[1,128], index: 8, kind: input, shape index: {}]   ;;  %s1460_s9 = inlined_call_operand.hbm [shape: bf16[128,128], index: 9, kind: input, shape index: {}]   ;;  %s1461_s10 = inlined_call_operand.hbm [shape: f32[1,128], index: 10, kind: input, shape index: {}]   ;;  %s1462_s11 = inlined_call_operand.hbm [shape: bf16[16,128], index: 11, kind: output, shape index: {}]  }
   0x1   :  { %17 = vsyncpa [#allocation6], 0 }
   0x2   :  { %18 = vsyncpa [#allocation9], 0 }
   0x3   :  { %19 = vsyncpa [#allocation12], 0 }
   0x4   :  { %20 = vsyncpa [#allocation15], 0 }
   0x5   :  { %21 = vsyncpa [#allocation18], 0 }
   0x6   :  { %22 = vsyncpa [#allocation4], 0  ;;  %s1160_s17 = smov [#allocation5]   ;;  %s1161_s19 = smov [#allocation8]  }
   0x7   :  { %s40_s18 = sshll.u32 %s1160_s17, 4  ;;  %s65_s20 = sshll.u32 %s1161_s19, 4  ;;  %s41_s18 = int_to_ptr.vmem [resolvable:$true] %s40_s18  ;;  %s1238_s20 = int_to_ptr.vmem [resolvable:$true] %s65_s20 }
   0x8   :  { %s882_s23 = scalar_lea.hbm %s1452_s1, 256 }
   0x9   :  { %p883_p0 = scmp.ne.s32.totalorder %s1452_s1, %s882_s23  ;;  %p886_p1 = scmp.lt.u32.totalorder %s882_s23, %s1452_s1 }
   0xb   :  { %p888_p2 = pnand %p886_p1, %p883_p0 }
   0xd   :  { %891 = shalt.err (!%p888_p2)
}
   0xe   :  { %s892_s28 = scalar_lea.vmem %s41_s18, 256  ;;  %p897_p4 = scmp.lt.s32.totalorder %s41_s18, %s41_s18 }
   0xf   :  { %p893_p3 = scmp.ne.s32.totalorder %s41_s18, %s892_s28  ;;  %p898_p5 = scmp.lt.s32.totalorder %s892_s28, %s892_s28 }
  0x11   :  { %p899_p6 = por %p898_p5, %p897_p4 }
  0x13   :  { %p900_p7 = pnand %p899_p6, %p893_p3 }
  0x15   :  { %903 = shalt.err (!%p900_p7)
}
  0x16   :  { %s1162_s29 = smov 128   ;;  %s1163_s30 = smov 8  }
  0x17   :  { %46 = dma.hbm_to_vmem [thread:$0]  %s1452_s1, 256, %s41_s18, [#allocation6], %s1162_s29, %s1162_s29, %s1163_s30  }
  0x18   :  { %s904_s16 = scalar_lea.hbm %s1454_s3, 16 }
  0x19   :  { %p905_p8 = scmp.ne.s32.totalorder %s1454_s3, %s904_s16  ;;  %p908_p9 = scmp.lt.u32.totalorder %s904_s16, %s1454_s3 }
  0x1b   :  { %p910_p10 = pnand %p908_p9, %p905_p8 }
  0x1d   :  { %913 = shalt.err (!%p910_p10)
}
  0x1e   :  { %s914_s23 = scalar_lea.vmem %s1238_s20, 16  ;;  %s918_s1 = scalar_lea.vmem %s1238_s20, 32 }
  0x1f   :  { %p915_p11 = scmp.ne.s32.totalorder %s1238_s20, %s914_s23  ;;  %p919_p12 = scmp.lt.s32.totalorder %s1238_s20, %s1238_s20 }
  0x20   :  { %p920_p13 = scmp.lt.s32.totalorder %s918_s1, %s914_s23 }
  0x22   :  { %p921_p0 = por %p920_p13, %p919_p12 }
  0x24   :  { %p922_p1 = pnand %p921_p0, %p915_p11 }
  0x26   :  { %925 = shalt.err (!%p922_p1)
}
  0x27   :  { %68 = dma.hbm_to_vmem [thread:$0]  %s1454_s3, 16, %s1238_s20, [#allocation9]  }
  0x28   :  { %s1164_s25 = smov [#allocation11]   ;;  %s926_s12 = scalar_lea.hbm %s1456_s5, 16 }
  0x29   :  { %s87_s26 = sshll.u32 %s1164_s25, 4  ;;  %p927_p2 = scmp.ne.s32.totalorder %s1456_s5, %s926_s12  ;;  %s88_s26 = int_to_ptr.vmem [resolvable:$true] %s87_s26 }
  0x2a   :  { %p930_p3 = scmp.lt.u32.totalorder %s926_s12, %s1456_s5 }
  0x2c   :  { %p932_p4 = pnand %p930_p3, %p927_p2 }
  0x2e   :  { %935 = shalt.err (!%p932_p4)
}
  0x2f   :  { %s936_s17 = scalar_lea.vmem %s88_s26, 16  ;;  %s940_s3 = scalar_lea.vmem %s88_s26, 32 }
  0x30   :  { %p937_p5 = scmp.ne.s32.totalorder %s88_s26, %s936_s17  ;;  %p941_p6 = scmp.lt.s32.totalorder %s88_s26, %s88_s26 }
  0x31   :  { %p942_p7 = scmp.lt.s32.totalorder %s940_s3, %s936_s17 }
  0x33   :  { %p943_p8 = por %p942_p7, %p941_p6 }
  0x35   :  { %p944_p9 = pnand %p943_p8, %p937_p5 }
  0x37   :  { %947 = shalt.err (!%p944_p9)
}
  0x38   :  { %90 = dma.hbm_to_vmem [thread:$0]  %s1456_s5, 16, %s88_s26, [#allocation12]  }
  0x39   :  { %s1165_s21 = smov [#allocation14]   ;;  %s1166_s23 = smov [#allocation17]  }
  0x3a   :  { %s108_s22 = sshll.u32 %s1165_s21, 4  ;;  %s130_s1 = sshll.u32 %s1166_s23, 4  ;;  %s109_s22 = int_to_ptr.vmem [resolvable:$true] %s108_s22  ;;  %s131_s1 = int_to_ptr.vmem [resolvable:$true] %s130_s1 }
  0x3b   :  { %s948_s25 = scalar_lea.hbm %s1458_s7, 128 }
  0x3c   :  { %p949_p10 = scmp.ne.s32.totalorder %s1458_s7, %s948_s25  ;;  %p952_p11 = scmp.lt.u32.totalorder %s948_s25, %s1458_s7 }
  0x3e   :  { %p954_p12 = pnand %p952_p11, %p949_p10 }
  0x40   :  { %957 = shalt.err (!%p954_p12)
}
  0x41   :  { %s958_s5 = scalar_lea.vmem %s109_s22, 128  ;;  %p963_p0 = scmp.lt.s32.totalorder %s109_s22, %s109_s22 }
  0x42   :  { %p959_p13 = scmp.ne.s32.totalorder %s109_s22, %s958_s5  ;;  %p964_p1 = scmp.lt.s32.totalorder %s958_s5, %s958_s5 }
  0x44   :  { %p965_p2 = por %p964_p1, %p963_p0 }
  0x46   :  { %p966_p3 = pnand %p965_p2, %p959_p13 }
  0x48   :  { %969 = shalt.err (!%p966_p3)
}
  0x49   :  { %s1167_s26 = smov 64   ;;  %s1168_s14 = smov 4  }
  0x4a   :  { %114 = dma.hbm_to_vmem [thread:$0]  %s1458_s7, 128, %s109_s22, [#allocation15], %s1167_s26, %s1167_s26, %s1168_s14  }
  0x4b   :  { %s970_s20 = scalar_lea.hbm %s1460_s9, 1024 }
  0x4c   :  { %p971_p4 = scmp.ne.s32.totalorder %s1460_s9, %s970_s20  ;;  %p974_p5 = scmp.lt.u32.totalorder %s970_s20, %s1460_s9 }
  0x4e   :  { %p976_p6 = pnand %p974_p5, %p971_p4 }
  0x50   :  { %979 = shalt.err (!%p976_p6)
}
  0x51   :  { %s980_s24 = scalar_lea.vmem %s131_s1, 1024  ;;  %p985_p8 = scmp.lt.s32.totalorder %s131_s1, %s131_s1 }
  0x52   :  { %p981_p7 = scmp.ne.s32.totalorder %s131_s1, %s980_s24  ;;  %p986_p9 = scmp.lt.s32.totalorder %s980_s24, %s980_s24 }
  0x54   :  { %p987_p10 = por %p986_p9, %p985_p8 }
  0x56   :  { %p988_p11 = pnand %p987_p10, %p981_p7 }
  0x58   :  { %991 = shalt.err (!%p988_p11)
}
  0x59   :  { %136 = dma.hbm_to_vmem [thread:$0]  %s1460_s9, 1024, %s131_s1, [#allocation18], %s1167_s26, %s1167_s26, %s1168_s14  }
  0x5a   :  { %s1169_s25 = smov [#allocation2]   ;;  %s1170_s28 = smov [#allocation7]  }
  0x5b   :  { %s28_s27 = sshll.u32 %s1169_s25, 4  ;;  %s52_s12 = sshll.u32 %s1170_s28, 4  ;;  %s29_s27 = int_to_ptr.vmem [resolvable:$true] %s28_s27  ;;  %s53_s12 = int_to_ptr.vmem [resolvable:$true] %s52_s12 }
  0x5c   :  { %s992_s15 = scalar_lea.hbm %s1451_s0, 256 }
  0x5d   :  { %p993_p12 = scmp.ne.s32.totalorder %s1451_s0, %s992_s15  ;;  %p996_p13 = scmp.lt.u32.totalorder %s992_s15, %s1451_s0 }
  0x5f   :  { %p998_p0 = pnand %p996_p13, %p993_p12 }
  0x61   :  { %1001 = shalt.err (!%p998_p0)
}
  0x62   :  { %s1002_s9 = scalar_lea.vmem %s29_s27, 256  ;;  %p1007_p2 = scmp.lt.s32.totalorder %s29_s27, %s29_s27 }
  0x63   :  { %p1003_p1 = scmp.ne.s32.totalorder %s29_s27, %s1002_s9  ;;  %p1008_p3 = scmp.lt.s32.totalorder %s1002_s9, %s1002_s9 }
  0x65   :  { %p1009_p4 = por %p1008_p3, %p1007_p2 }
  0x67   :  { %p1010_p5 = pnand %p1009_p4, %p1003_p1 }
  0x69   :  { %1013 = shalt.err (!%p1010_p5)
}
  0x6a   :  { %34 = dma.hbm_to_vmem [thread:$0]  %s1451_s0, 256, %s29_s27, [#allocation3], %s1162_s29, %s1162_s29, %s1163_s30  }
  0x6b   :  { %s1014_s18 = scalar_lea.hbm %s1453_s2, 256 }
  0x6c   :  { %p1015_p6 = scmp.ne.s32.totalorder %s1453_s2, %s1014_s18  ;;  %p1018_p7 = scmp.lt.u32.totalorder %s1014_s18, %s1453_s2 }
  0x6e   :  { %p1020_p8 = pnand %p1018_p7, %p1015_p6 }
  0x70   :  { %1023 = shalt.err (!%p1020_p8)
}
  0x71   :  { %s1024_s28 = scalar_lea.vmem %s53_s12, 256  ;;  %p1029_p10 = scmp.lt.s32.totalorder %s53_s12, %s53_s12 }
  0x72   :  { %p1025_p9 = scmp.ne.s32.totalorder %s53_s12, %s1024_s28  ;;  %p1030_p11 = scmp.lt.s32.totalorder %s1024_s28, %s1024_s28 }
  0x74   :  { %p1031_p12 = por %p1030_p11, %p1029_p10 }
  0x76   :  { %p1032_p13 = pnand %p1031_p12, %p1025_p9 }
  0x78   :  { %1035 = shalt.err (!%p1032_p13)
}
  0x79   :  { %58 = dma.hbm_to_vmem [thread:$0]  %s1453_s2, 256, %s53_s12, [#allocation6], %s1167_s26, %s1167_s26, %s1168_s14  }
  0x7a   :  { %s1171_s30 = smov [#allocation10]   ;;  %s1172_s13 = smov [#allocation13]  }
  0x7b   :  { %s74_s27 = sshll.u32 %s1171_s30, 4  ;;  %s96_s5 = sshll.u32 %s1172_s13, 4  ;;  %s75_s27 = int_to_ptr.vmem [resolvable:$true] %s74_s27  ;;  %s97_s5 = int_to_ptr.vmem [resolvable:$true] %s96_s5 }
  0x7c   :  { %s1036_s17 = scalar_lea.hbm %s1455_s4, 1024 }
  0x7d   :  { %p1037_p0 = scmp.ne.s32.totalorder %s1455_s4, %s1036_s17  ;;  %p1040_p1 = scmp.lt.u32.totalorder %s1036_s17, %s1455_s4 }
  0x7f   :  { %p1042_p2 = pnand %p1040_p1, %p1037_p0 }
  0x81   :  { %1045 = shalt.err (!%p1042_p2)
}
  0x82   :  { %s1046_s2 = scalar_lea.vmem %s75_s27, 1024  ;;  %p1051_p4 = scmp.lt.s32.totalorder %s75_s27, %s75_s27 }
  0x83   :  { %p1047_p3 = scmp.ne.s32.totalorder %s75_s27, %s1046_s2  ;;  %p1052_p5 = scmp.lt.s32.totalorder %s1046_s2, %s1046_s2 }
  0x85   :  { %p1053_p6 = por %p1052_p5, %p1051_p4 }
  0x87   :  { %p1054_p7 = pnand %p1053_p6, %p1047_p3 }
  0x89   :  { %1057 = shalt.err (!%p1054_p7)
}
  0x8a   :  { %80 = dma.hbm_to_vmem [thread:$0]  %s1455_s4, 1024, %s75_s27, [#allocation9], %s1167_s26, %s1167_s26, %s1168_s14  }
  0x8b   :  { %s1058_s18 = scalar_lea.hbm %s1457_s6, 1024 }
  0x8c   :  { %p1059_p8 = scmp.ne.s32.totalorder %s1457_s6, %s1058_s18  ;;  %p1062_p9 = scmp.lt.u32.totalorder %s1058_s18, %s1457_s6 }
  0x8e   :  { %p1064_p10 = pnand %p1062_p9, %p1059_p8 }
  0x90   :  { %1067 = shalt.err (!%p1064_p10)
}
  0x91   :  { %s1068_s28 = scalar_lea.vmem %s97_s5, 1024  ;;  %p1073_p12 = scmp.lt.s32.totalorder %s97_s5, %s97_s5 }
  0x92   :  { %p1069_p11 = scmp.ne.s32.totalorder %s97_s5, %s1068_s28  ;;  %p1074_p13 = scmp.lt.s32.totalorder %s1068_s28, %s1068_s28 }
  0x94   :  { %p1075_p0 = por %p1074_p13, %p1073_p12 }
  0x96   :  { %p1076_p1 = pnand %p1075_p0, %p1069_p11 }
  0x98   :  { %1079 = shalt.err (!%p1076_p1)
}
  0x99   :  { %102 = dma.hbm_to_vmem [thread:$0]  %s1457_s6, 1024, %s97_s5, [#allocation12], %s1167_s26, %s1167_s26, %s1168_s14  }
  0x9a   :  { %s1173_s29 = smov [#allocation16]   ;;  %s1174_s27 = smov [#allocation19]  }
  0x9b   :  { %s121_s30 = sshll.u32 %s1173_s29, 4  ;;  %s143_s13 = sshll.u32 %s1174_s27, 4  ;;  %s122_s30 = int_to_ptr.vmem [resolvable:$true] %s121_s30  ;;  %s144_s13 = int_to_ptr.vmem [resolvable:$true] %s143_s13 }
  0x9c   :  { %s1080_s17 = scalar_lea.hbm %s1459_s8, 16 }
  0x9d   :  { %p1081_p2 = scmp.ne.s32.totalorder %s1459_s8, %s1080_s17  ;;  %p1084_p3 = scmp.lt.u32.totalorder %s1080_s17, %s1459_s8 }
  0x9f   :  { %p1086_p4 = pnand %p1084_p3, %p1081_p2 }
  0xa1   :  { %1089 = shalt.err (!%p1086_p4)
}
  0xa2   :  { %s1090_s6 = scalar_lea.vmem %s122_s30, 16  ;;  %s1094_s5 = scalar_lea.vmem %s122_s30, 32 }
  0xa3   :  { %p1091_p5 = scmp.ne.s32.totalorder %s122_s30, %s1090_s6  ;;  %p1095_p6 = scmp.lt.s32.totalorder %s122_s30, %s122_s30 }
  0xa4   :  { %p1096_p7 = scmp.lt.s32.totalorder %s1094_s5, %s1090_s6 }
  0xa6   :  { %p1097_p8 = por %p1096_p7, %p1095_p6 }
  0xa8   :  { %p1098_p9 = pnand %p1097_p8, %p1091_p5 }
  0xaa   :  { %1101 = shalt.err (!%p1098_p9)
}
  0xab   :  { %124 = dma.hbm_to_vmem [thread:$0]  %s1459_s8, 16, %s122_s30, [#allocation15]  }
  0xac   :  { %s1102_s23 = scalar_lea.hbm %s1461_s10, 16 }
  0xad   :  { %p1103_p10 = scmp.ne.s32.totalorder %s1461_s10, %s1102_s23  ;;  %p1106_p11 = scmp.lt.u32.totalorder %s1102_s23, %s1461_s10 }
  0xaf   :  { %p1108_p12 = pnand %p1106_p11, %p1103_p10 }
  0xb1   :  { %1111 = shalt.err (!%p1108_p12)
}
  0xb2   :  { %s1112_s25 = scalar_lea.vmem %s144_s13, 16  ;;  %s1116_s28 = scalar_lea.vmem %s144_s13, 32 }
  0xb3   :  { %p1113_p13 = scmp.ne.s32.totalorder %s144_s13, %s1112_s25  ;;  %p1117_p0 = scmp.lt.s32.totalorder %s144_s13, %s144_s13 }
  0xb4   :  { %p1118_p1 = scmp.lt.s32.totalorder %s1116_s28, %s1112_s25 }
  0xb6   :  { %p1119_p2 = por %p1118_p1, %p1117_p0 }
  0xb8   :  { %p1120_p3 = pnand %p1119_p2, %p1113_p13 }
  0xba   :  { %1123 = shalt.err (!%p1120_p3)
}
  0xbb   :  { %146 = dma.hbm_to_vmem [thread:$0]  %s1461_s10, 16, %s144_s13, [#allocation18]  }
  0xbc   :  { %1146 = dma.done.wait [#allocation3], 256  }
  0xbd   :  { %1147 = vsyncadd [#allocation3], 4294967040 }
  0xbe   :  { %1148 = dma.done.wait [#allocation6], 512  }
  0xbf   :  { %1149 = vsyncadd [#allocation6], 4294966784 }
  0xc0   :  { %1150 = dma.done.wait [#allocation9], 1040  }
  0xc1   :  { %1151 = vsyncadd [#allocation9], 4294966256 }
  0xc2   :  { %1152 = dma.done.wait [#allocation12], 1040  }
  0xc3   :  { %1153 = vsyncadd [#allocation12], 4294966256 }
  0xc4   :  { %1154 = dma.done.wait [#allocation15], 144  }
  0xc5   :  { %1155 = vsyncadd [#allocation15], 4294967152 }
  0xc6   :  { %1156 = dma.done.wait [#allocation18], 1040  }
  0xc7   :  { %1157 = vsyncadd [#allocation18], 4294966256  ;;  %v1175_v0 = vmov 0.0   ;;  %vm1176_vm0 = vmmov 0   ;;  %v855_v1 = vld [vmem:[#allocation7] sm:$0xff]   ;;  %v856_v2 = vld [vmem:[#allocation7 + $0x8] sm:$0xff]  }
  0xc8   :  { %763 = vmatprep.subr.bf16.mxu0 %v1175_v0  ;;  %767 = vmatprep.mubr.msk.bf16.mxu0 %vm1176_vm0, %v1175_v0  ;;  %v181_v3 = vld [vmem:[#allocation2] sm:$0xff]  ;;  %v182_v4 = vld [vmem:[#allocation2 + $0x8] sm:$0xff]  ;;  %v857_v5 = vld [vmem:[#allocation10] sm:$0xff]   ;;  %vm210_vm1 = vcmask 261120   ;;  %vm397_vm2 = vcmask 130048   ;;  %s1177_s10 = smov [#allocation20]  }
  0xc9   :  { %771 = vmatprep.subr.bf16.mxu1 %v1175_v0  ;;  %787 = vmatprep.mubr.msk.bf16.mxu1 %vm1176_vm0, %v1175_v0  ;;  %v183_v6 = vpack.c.bf16 %v182_v4, %v181_v3  ;;  %v858_v7 = vld [vmem:[#allocation10 + $0x8] sm:$0xff]   ;;  %v859_v8 = vld [vmem:[#allocation10 + $0x10] sm:$0xff]   ;;  %v860_v9 = vld [vmem:[#allocation10 + $0x18] sm:$0xff]   ;;  %s672_s0 = sshll.u32 %s1177_s10, 4  ;;  %s673_s0 = int_to_ptr.vmem [resolvable:$true] %s672_s0 }
  0xca   :  { %764 = vmatpush3.bf16.msra.mxu0 %v855_v1  ;;  %772 = vmatpush3.bf16.msra.mxu1 %v857_v5  ;;  %v861_v10 = vld [vmem:[#allocation10 + $0x20] sm:$0xff]   ;;  %v862_v11 = vld [vmem:[#allocation10 + $0x28] sm:$0xff]   ;;  %v863_v12 = vld [vmem:[#allocation10 + $0x30] sm:$0xff]   ;;  %s1124_s29 = scalar_lea.vmem %s673_s0, 128  ;;  %p1129_p5 = scmp.lt.s32.totalorder %s673_s0, %s673_s0 }
  0xcb   :  { %765 = vmatprep.subr.bf16.mxu0 %v1175_v0  ;;  %773 = vmatprep.subr.bf16.mxu1 %v1175_v0  ;;  %v864_v13 = vld [vmem:[#allocation10 + $0x38] sm:$0xff]   ;;  %v865_v14 = vld [vmem:[#allocation14] sm:$0xff]   ;;  %v867_v19 = vld [vmem:[#allocation13 + $0x8] sm:$0xff]   ;;  %p1125_p4 = scmp.ne.s32.totalorder %s673_s0, %s1124_s29  ;;  %p1130_p6 = scmp.lt.s32.totalorder %s1124_s29, %s1124_s29 }
  0xcc   :  { %v184_v15 = vld [vmem:[#allocation5] sm:$0xff]  ;;  %v185_v16 = vld [vmem:[#allocation5 + $0x8] sm:$0xff]  ;;  %v868_v20 = vld [vmem:[#allocation13 + $0x10] sm:$0xff]  }
  0xcd   :  { %v186_v17 = vpack.c.bf16 %v185_v16, %v184_v15  ;;  %v866_v18 = vld [vmem:[#allocation13] sm:$0xff]   ;;  %v869_v21 = vld [vmem:[#allocation13 + $0x18] sm:$0xff]   ;;  %v871_v23 = vld [vmem:[#allocation13 + $0x28] sm:$0xff]   ;;  %p1131_p7 = por %p1130_p6, %p1129_p5 }
  0xce   :  { %766 = vmatpush3.bf16.msra.mxu0 %v856_v2  ;;  %774 = vmatpush3.bf16.msra.mxu1 %v858_v7  ;;  %v870_v22 = vld [vmem:[#allocation13 + $0x20] sm:$0xff]   ;;  %v689_v24 = vld [vmem:[#allocation8] ss:$0 sm:$0xff]  ;;  %v872_v34 = vld [vmem:[#allocation13 + $0x30] sm:$0xff]  }
  0xcf   :  { %791 = vmatprep.subr.bf16.mxu0 %v1175_v0  ;;  %775 = vmatprep.subr.bf16.mxu1 %v1175_v0  ;;  %v873_v35 = vld [vmem:[#allocation13 + $0x38] sm:$0xff]   ;;  %v874_v37 = vld [vmem:[#allocation17] sm:$0xff]   ;;  %v877_v43 = vld [vmem:[#allocation17 + $0x18] sm:$0xff]   ;;  %p1132_p8 = pnand %p1131_p7, %p1125_p4 }
  0xd0   :  { %v875_v40 = vld [vmem:[#allocation17 + $0x8] sm:$0xff]   ;;  %v876_v42 = vld [vmem:[#allocation17 + $0x10] sm:$0xff]   ;;  %v878_v44 = vld [vmem:[#allocation17 + $0x20] sm:$0xff]  }
  0xd1   :  { %768 = vmatmul.mubr.msk.bf16.vlgmr.msra.gmra.mrb[0].mxu0 %vm210_vm1, %v183_v6  ;;  %v693_v45 = vld [vmem:[#allocation11] ss:$0 sm:$0xff]  ;;  %v879_v55 = vld [vmem:[#allocation17 + $0x28] sm:$0xff]   ;;  %v881_v57 = vld [vmem:[#allocation17 + $0x38] sm:$0xff]  }
  0xd2   :  { %793 = vmatprep.mubr.msk.bf16.mxu0 %vm1176_vm0, %v1175_v0  ;;  %776 = vmatpush3.bf16.msra.mxu1 %v859_v8  ;;  %v880_v56 = vld [vmem:[#allocation17 + $0x30] sm:$0xff]   ;;  %v712_v59 = vld [vmem:[#allocation16] ss:$0 sm:$0xff]  ;;  %v713_v7 = vld [vmem:[#allocation19] ss:$0 sm:$0xff] }
  0xd3   :  { %777 = vmatprep.subr.bf16.mxu1 %v1175_v0  ;;  %792 = vmatpush3.bf16.msra.mxu0 %v865_v14 }
  0xd4   :  { %797 = vmatprep.subr.bf16.mxu0 %v1175_v0 }
  0xd6   :  { %778 = vmatpush3.bf16.msra.mxu1 %v860_v9 }
  0xd7   :  { %779 = vmatprep.subr.bf16.mxu1 %v1175_v0 }
  0xd9   :  { %794 = vmatmul.mubr.msk.bf16.vlgmr.msra.gmra.mrb[4].mxu0 %vm397_vm2, %v186_v17 }
  0xda   :  { %780 = vmatpush3.bf16.msra.mxu1 %v861_v10  ;;  %798 = vmatpush3.bf16.msra.mxu0 %v866_v18 }
  0xdb   :  { %781 = vmatprep.subr.bf16.mxu1 %v1175_v0  ;;  %813 = vmatprep.mubr.msk.bf16.mxu0 %vm1176_vm0, %v1175_v0 }
  0xdc   :  { %799 = vmatprep.subr.bf16.mxu0 %v1175_v0 }
  0xde   :  { %782 = vmatpush3.bf16.msra.mxu1 %v862_v11  ;;  %800 = vmatpush3.bf16.msra.mxu0 %v867_v19 }
  0xdf   :  { %783 = vmatprep.subr.bf16.mxu1 %v1175_v0  ;;  %801 = vmatprep.subr.bf16.mxu0 %v1175_v0 }
  0xe2   :  { %784 = vmatpush3.bf16.msra.mxu1 %v863_v12  ;;  %802 = vmatpush3.bf16.msra.mxu0 %v868_v20 }
  0xe3   :  { %785 = vmatprep.subr.bf16.mxu1 %v1175_v0  ;;  %803 = vmatprep.subr.bf16.mxu0 %v1175_v0 }
  0xe6   :  { %786 = vmatpush3.bf16.msra.mxu1 %v864_v13  ;;  %804 = vmatpush3.bf16.msra.mxu0 %v869_v21 }
  0xe7   :  { %817 = vmatprep.subr.bf16.mxu1 %v1175_v0  ;;  %805 = vmatprep.subr.bf16.mxu0 %v1175_v0 }
  0xea   :  { %806 = vmatpush3.bf16.msra.mxu0 %v870_v22 }
  0xeb   :  { %807 = vmatprep.subr.bf16.mxu0 %v1175_v0 }
  0xee   :  { %808 = vmatpush3.bf16.msra.mxu0 %v871_v23 }
  0xef   :  { %809 = vmatprep.subr.bf16.mxu0 %v1175_v0 }
  0xf2   :  { %810 = vmatpush3.bf16.msra.mxu0 %v872_v34 }
  0xf3   :  { %811 = vmatprep.subr.bf16.mxu0 %v1175_v0 }
  0xf6   :  { %812 = vmatpush3.bf16.msra.mxu0 %v873_v35 }
 0x1a4   :  { %v248_v25 = vpop.f32.mrb[0].mxu0 }
 0x1a5   :  { %v249_v26 = vadd.f32 %v689_v24, %v248_v25  ;;  %v769_v27 = vpop.f32.mrb[1].mxu0 }
 0x1a6   :  { %v251_v28 = vpop.f32.mrb[2].mxu0 }
 0x1a7   :  { %v252_v29 = vadd.f32 %v689_v24, %v251_v28  ;;  %v770_v30 = vpop.f32.mrb[3].mxu0  ;;  %v255_v31 = vmax.f32 %v249_v26, 0.0 }
 0x1a9   :  { %v256_v32 = vmax.f32 %v252_v29, 0.0 }
 0x1ab   :  { %v257_v33 = vpack.c.bf16 %v256_v32, %v255_v31 }
 0x1ac   :  { %v435_v36 = vpop.f32.mrb[4].mxu0 }
 0x1ad   :  { %788 = vmatmul.mubr.bf16.vlgmr.msra.gmra.mrb[0].mxu1 %v257_v33  ;;  %v795_v38 = vpop.f32.mrb[5].mxu0 }
 0x1ae   :  { %833 = vmatprep.mubr.msk.bf16.mxu1 %vm1176_vm0, %v1175_v0  ;;  %v438_v39 = vpop.f32.mrb[6].mxu0  ;;  %818 = vmatpush3.bf16.msra.mxu1 %v874_v37 }
 0x1af   :  { %v796_v41 = vpop.f32.mrb[7].mxu0  ;;  %819 = vmatprep.subr.bf16.mxu1 %v1175_v0 }
 0x1b2   :  { %820 = vmatpush3.bf16.msra.mxu1 %v875_v40 }
 0x1b3   :  { %821 = vmatprep.subr.bf16.mxu1 %v1175_v0 }
 0x1b6   :  { %822 = vmatpush3.bf16.msra.mxu1 %v876_v42 }
 0x1b7   :  { %823 = vmatprep.subr.bf16.mxu1 %v1175_v0 }
 0x1ba   :  { %824 = vmatpush3.bf16.msra.mxu1 %v877_v43 }
 0x1bb   :  { %825 = vmatprep.subr.bf16.mxu1 %v1175_v0 }
 0x1be   :  { %826 = vmatpush3.bf16.msra.mxu1 %v878_v44 }
 0x1bf   :  { %827 = vmatprep.subr.bf16.mxu1 %v1175_v0 }
 0x1c2   :  { %828 = vmatpush3.bf16.msra.mxu1 %v879_v55 }
 0x1c3   :  { %829 = vmatprep.subr.bf16.mxu1 %v1175_v0 }
 0x1c6   :  { %830 = vmatpush3.bf16.msra.mxu1 %v880_v56 }
 0x1c7   :  { %831 = vmatprep.subr.bf16.mxu1 %v1175_v0 }
 0x1ca   :  { %832 = vmatpush3.bf16.msra.mxu1 %v881_v57 }
 0x280   :  { %v363_v46 = vpop.f32.mrb[0].mxu1 }
 0x281   :  { %v364_v47 = vadd.f32 %v693_v45, %v363_v46  ;;  %v789_v48 = vpop.f32.mrb[1].mxu1 }
 0x282   :  { %v366_v49 = vpop.f32.mrb[2].mxu1 }
 0x283   :  { %v367_v50 = vadd.f32 %v693_v45, %v366_v49  ;;  %v790_v51 = vpop.f32.mrb[3].mxu1  ;;  %v370_v52 = vmax.f32 %v364_v47, 0.0 }
 0x285   :  { %v371_v53 = vmax.f32 %v367_v50, 0.0 }
 0x287   :  { %v372_v54 = vpack.c.bf16 %v371_v53, %v370_v52 }
 0x289   :  { %814 = vmatmul.mubr.bf16.vlgmr.msra.gmra.mrb[8].mxu0 %v372_v54 }
 0x35c   :  { %v524_v58 = vpop.f32.mrb[8].mxu0 }
 0x35d   :  { %v525_v60 = vadd.f32 %v524_v58, %v435_v36  ;;  %v815_v61 = vpop.f32.mrb[9].mxu0 }
 0x35e   :  { %v527_v62 = vpop.f32.mrb[10].mxu0 }
 0x35f   :  { %v538_v63 = vadd.f32 %v712_v59, %v525_v60  ;;  %v528_v1 = vadd.f32 %v527_v62, %v438_v39  ;;  %v816_v2 = vpop.f32.mrb[11].mxu0 }
 0x361   :  { %v539_v3 = vadd.f32 %v712_v59, %v528_v1  ;;  %v540_v4 = vmax.f32 %v538_v63, 0.0 }
 0x363   :  { %v541_v5 = vmax.f32 %v539_v3, 0.0 }
 0x365   :  { %v542_v6 = vpack.c.bf16 %v541_v5, %v540_v4 }
 0x367   :  { %834 = vmatmul.mubr.bf16.vlgmr.msra.gmra.mrb[4].mxu1 %v542_v6 }
 0x43a   :  { %v648_v8 = vpop.f32.mrb[4].mxu1 }
 0x43b   :  { %v649_v9 = vadd.f32 %v713_v7, %v648_v8  ;;  %v835_v10 = vpop.f32.mrb[5].mxu1 }
 0x43c   :  { %v651_v0 = vpop.f32.mrb[6].mxu1 }
 0x43d   :  { %v652_v11 = vadd.f32 %v713_v7, %v651_v0  ;;  %v836_v12 = vpop.f32.mrb[7].mxu1  ;;  %v655_v13 = vmax.f32 %v649_v9, 0.0 }
 0x43f   :  { %v656_v14 = vmax.f32 %v652_v11, 0.0 }
 0x441   :  { %v729_v15 = vpack.c.bf16 %v656_v14, %v655_v13 }
 0x443   :  { %730 = vst [vmem:[#allocation20] sm:$0xff] %v729_v15  }
 0x444   :  { %1135 = shalt.err (!%p1132_p8)
}
 0x445   :  { %s1136_s13 = scalar_lea.hbm %s1462_s11, 128 }
 0x446   :  { %p1137_p9 = scmp.ne.s32.totalorder %s1462_s11, %s1136_s13  ;;  %p1140_p10 = scmp.lt.u32.totalorder %s1136_s13, %s1462_s11 }
 0x448   :  { %p1142_p11 = pnand %p1140_p10, %p1137_p9 }
 0x44a   :  { %1145 = shalt.err (!%p1142_p11)
}
 0x44b   :  { %678 = dma.vmem_to_hbm [thread:$0]  %s673_s0, 128, %s1462_s11, [#allocation4], %s1167_s26, %s1167_s26, %s1168_s14  }
 0x44c   :  { %1158 = dma.done.wait [#allocation4], 128  }
 0x44d   :  { %1159 = vsyncadd [#allocation4], 4294967168 }
 0x44e   :  { %682 = vsyncpa [#allocation3], 1 }
 0x44f   :  { %683 = vsyncpa [#allocation6], 1 }
 0x450   :  { %684 = vsyncpa [#allocation9], 1 }
 0x451   :  { %685 = vsyncpa [#allocation12], 1 }
 0x452   :  { %686 = vsyncpa [#allocation15], 1 }
 0x453   :  { %687 = vsyncpa [#allocation18], 1 }
 0x454   :  { %688 = vsyncpa [#allocation4], 1 }

</bundles_post_ra>
